<compile_context>
chip_gen: v7x
topology: tpu7x:2x2x1
jax: 0.10.0
libtpu: 0.0.40
codegen_flags: <defaults>
</compile_context>

<pallas_src>
import jax
import jax.numpy as jnp
import numpy as np
from jax.experimental import pallas as pl
from jax.experimental.pallas import tpu as pltpu

# ---------------- static problem configuration (smallest shapes consistent w/ module) --
B = 2              # batch
H_IN = 63          # height (EEG channels) -- second conv kernel is hard-coded (63, 1)
W_IN = 125         # width (time samples); must be >= 25 + 51 - 1 = 75
C1 = 40            # channels after first conv
EMB = 40           # emb_size
KW = 25            # temporal conv kernel width
POOL_K, POOL_S = 51, 5
W_CONV = W_IN - KW + 1                      # 101
W_POOL = (W_CONV - POOL_K) // POOL_S + 1    # 11
CW = C1 * W_POOL                            # 440  (lane-dense stage-1 output width)
K2 = H_IN * C1                              # 2520 (contraction of the (63,1) conv, h-major)
BN_EPS = 1e-5


def _elu(v):
    return jnp.where(v > 0, v, jnp.exp(jnp.minimum(v, 0.0)) - 1.0)


# ---------------- kernel 1: folded Conv(1->40,(1,25)) + AvgPool + BN1(eval) + ELU -------
def _front_kernel(x_ref, e_ref, b1_ref, o_ref):
    x = x_ref[0]                                                    # (H_IN, W_IN) f32
    # conv + avg-pool + BN1 scale folded into one constant -> single MXU GEMM
    y = jnp.dot(x, e_ref[...], preferred_element_type=jnp.float32)  # (H_IN, C1*W_POOL)
    y = y + b1_ref[...]                                             # folded conv-bias + BN shift
    y = _elu(y)                                                     # f32 elementwise
    o_ref[0] = y.astype(jnp.bfloat16)                               # bf16 store (halves HBM traffic)


# ---------------- kernel 2: Conv(40->40,(63,1)) + BN2 + ELU + Dropout(eval) + 1x1 proj --
def _head_kernel(a_ref, w2_ref, b2_ref, wp_ref, bp_ref, o_ref):
    a2 = a_ref[0]                                                   # (K2, W_POOL) bf16
    # (63,1) conv as one bf16 GEMM over the h-major (h*C1+ci) axis, BN2 scale pre-folded
    y = jnp.dot(w2_ref[...], a2, preferred_element_type=jnp.float32)   # (C1, W_POOL) f32
    y = y + b2_ref[...]                                             # folded conv-bias + BN2 shift
    y = _elu(y)
    # TODO(synk): Dropout(0.5) training-mode masking not implemented (eval => identity).
    o = jnp.dot(wp_ref[...], y, preferred_element_type=jnp.float32) + bp_ref[...]
    o_ref[0] = o                                                    # (EMB, W_POOL) f32


# ---------------- wrapper ---------------------------------------------------------------
def patch_embedding_forward(x, params):
    """x: (B, 1, 63, W_IN) float32 NCHW.  Returns (B, W_POOL, EMB)."""
    bx = x.shape[0]
    x3 = x.reshape(bx, H_IN, W_IN)

    front = pl.pallas_call(
        _front_kernel,
        out_shape=jax.ShapeDtypeStruct((bx, H_IN, CW), jnp.bfloat16),
        grid_spec=pltpu.PrefetchScalarGridSpec(
            num_scalar_prefetch=0,
            grid=(bx,),
            in_specs=[
                pl.BlockSpec((1, H_IN, W_IN), lambda b: (b, 0, 0)),   # x[b]
                pl.BlockSpec((W_IN, CW), lambda b: (0, 0)),           # folded conv+pool+BN1 matrix
                pl.BlockSpec((1, CW), lambda b: (0, 0)),              # folded bias
            ],
            out_specs=pl.BlockSpec((1, H_IN, CW), lambda b: (b, 0, 0)),
        ),
        compiler_params=pltpu.CompilerParams(dimension_semantics=("parallel",)),
    )(x3, params["E"], params["bias1"])

    # free (contiguous) regroup into the head-GEMM layout: rows = h*C1+ci, cols = w
    a2 = front.reshape(bx, K2, W_POOL)

    out = pl.pallas_call(
        _head_kernel,
        out_shape=jax.ShapeDtypeStruct((bx, EMB, W_POOL), jnp.float32),
        grid_spec=pltpu.PrefetchScalarGridSpec(
            num_scalar_prefetch=0,
            grid=(bx,),
            in_specs=[
                pl.BlockSpec((1, K2, W_POOL), lambda b: (b, 0, 0)),   # stage-1 activations (bf16)
                pl.BlockSpec((C1, K2), lambda b: (0, 0)),             # (63,1)-conv weight (bf16)
                pl.BlockSpec((C1, 1), lambda b: (0, 0)),              # folded bias2
                pl.BlockSpec((EMB, C1), lambda b: (0, 0)),            # 1x1 projection weight
                pl.BlockSpec((EMB, 1), lambda b: (0, 0)),             # projection bias
            ],
            out_specs=pl.BlockSpec((1, EMB, W_POOL), lambda b: (b, 0, 0)),
        ),
        compiler_params=pltpu.CompilerParams(dimension_semantics=("parallel",)),
    )(a2, params["w2f"], params["b2f"], params["wp"], params["bp"])

    # Rearrange('b e (h) (w) -> b (h w) e') with h == 1  (tiny: 2*40*11 elements)
    return jnp.transpose(out, (0, 2, 1))


# ---------------- deterministic parameter setup -----------------------------------------
def init_params(key):
    ks = jax.random.split(key, 16)
    raw = {}
    raw["w1_oihw"] = 0.5 * jax.random.normal(ks[0], (C1, 1, 1, KW), jnp.float32)
    raw["b1"] = 0.1 * jax.random.normal(ks[1], (C1,), jnp.float32)
    raw["g1"] = 1.0 + 0.1 * jax.random.normal(ks[2], (C1,), jnp.float32)
    raw["beta1"] = 0.1 * jax.random.normal(ks[3], (C1,), jnp.float32)
    raw["rm1"] = 0.1 * jax.random.normal(ks[4], (C1,), jnp.float32)
    raw["rv1"] = 0.05 + 0.1 * jax.random.uniform(ks[5], (C1,), jnp.float32)

    raw["w2_oihw"] = (1.0 / np.sqrt(K2)) * jax.random.normal(ks[6], (C1, C1, H_IN, 1), jnp.float32)
    raw["b2"] = 0.1 * jax.random.normal(ks[7], (C1,), jnp.float32)
    raw["g2"] = 1.0 + 0.1 * jax.random.normal(ks[8], (C1,), jnp.float32)
    raw["beta2"] = 0.1 * jax.random.normal(ks[9], (C1,), jnp.float32)
    raw["rm2"] = 0.1 * jax.random.normal(ks[10], (C1,), jnp.float32)
    raw["rv2"] = 0.05 + 0.1 * jax.random.uniform(ks[11], (C1,), jnp.float32)

    raw["wp_oihw"] = (1.0 / np.sqrt(C1)) * jax.random.normal(ks[12], (EMB, C1, 1, 1), jnp.float32)
    raw["bp"] = 0.1 * jax.random.normal(ks[13], (EMB,), jnp.float32)

    # ---- host-side folding into kernel-friendly constants --------------------------------
    w1 = np.asarray(raw["w1_oihw"])[:, 0, 0, :]                     # (C1, KW)
    b1 = np.asarray(raw["b1"]); g1 = np.asarray(raw["g1"])
    beta1 = np.asarray(raw["beta1"]); rm1 = np.asarray(raw["rm1"]); rv1 = np.asarray(raw["rv1"])
    s1 = g1 / np.sqrt(rv1 + BN_EPS)
    t1 = beta1 - rm1 * s1

    # average-pool matrix (W_CONV, W_POOL)
    pool = np.zeros((W_CONV, W_POOL), np.float32)
    for j in range(W_POOL):
        pool[POOL_S * j: POOL_S * j + POOL_K, j] = 1.0 / POOL_K

    # per-channel temporal-conv band matrices: Cmat[c, j+k, j] = w1[c, k]
    Cmat = np.zeros((C1, W_IN, W_CONV), np.float32)
    cols = np.arange(W_CONV)
    for k in range(KW):
        Cmat[:, cols + k, cols] = w1[:, k][:, None]
    # folded conv + pool + BN1-scale constant: E[i, c*W_POOL + w]
    EP = np.einsum("cij,jw->icw", Cmat, pool)                       # (W_IN, C1, W_POOL)
    E = (EP * s1[None, :, None]).reshape(W_IN, CW).astype(np.float32)
    # folded bias (conv bias commutes through the pooling matrix: its columns sum to 1)
    bias1 = np.repeat(s1 * b1 + t1, W_POOL).reshape(1, CW).astype(np.float32)

    b2 = np.asarray(raw["b2"]); g2 = np.asarray(raw["g2"])
    beta2 = np.asarray(raw["beta2"]); rm2 = np.asarray(raw["rm2"]); rv2 = np.asarray(raw["rv2"])
    s2 = g2 / np.sqrt(rv2 + BN_EPS)
    t2 = beta2 - rm2 * s2
    # (63,1) conv weight, h-major contraction order (h*C1 + ci), BN2 scale pre-folded
    w2 = np.asarray(raw["w2_oihw"])[:, :, :, 0]                     # (co, ci, h)
    w2 = np.transpose(w2, (0, 2, 1)).reshape(C1, K2)                # (co, h*C1+ci)
    w2f = (s2[:, None] * w2).astype(np.float32)
    b2f = (s2 * b2 + t2).reshape(C1, 1).astype(np.float32)

    wp = np.asarray(raw["wp_oihw"])[:, :, 0, 0].astype(np.float32)  # (EMB, C1)
    bp = np.asarray(raw["bp"]).reshape(EMB, 1).astype(np.float32)

    kparams = {
        "E": jnp.asarray(E),                                        # (W_IN, 440) f32
        "bias1": jnp.asarray(bias1),                                # (1, 440)   f32
        "w2f": jnp.asarray(w2f, dtype=jnp.bfloat16),                # (40, 2520) bf16
        "b2f": jnp.asarray(b2f),                                    # (40, 1)    f32
        "wp": jnp.asarray(wp),                                      # (40, 40)   f32
        "bp": jnp.asarray(bp),                                      # (40, 1)    f32
    }
    return kparams, raw


# ---------------- pure-JAX reference (eval-mode module semantics) ------------------------
def reference_forward(x, raw):
    dn = ("NCHW", "OIHW", "NCHW")
    elu = lambda v: jnp.where(v > 0, v, jnp.exp(jnp.minimum(v, 0.0)) - 1.0)
    bc = lambda v: v.reshape(1, -1, 1, 1)

    y = jax.lax.conv_general_dilated(x, raw["w1_oihw"], (1, 1), "VALID", dimension_numbers=dn)
    y = y + bc(raw["b1"])
    y = jax.lax.reduce_window(y, 0.0, jax.lax.add, (1, 1, 1, POOL_K), (1, 1, 1, POOL_S), "VALID") / POOL_K
    y = (y - bc(raw["rm1"])) * bc(raw["g1"] / jnp.sqrt(raw["rv1"] + BN_EPS)) + bc(raw["beta1"])
    y = elu(y)
    y = jax.lax.conv_general_dilated(y, raw["w2_oihw"], (1, 1), "VALID", dimension_numbers=dn)
    y = y + bc(raw["b2"])
    y = (y - bc(raw["rm2"])) * bc(raw["g2"] / jnp.sqrt(raw["rv2"] + BN_EPS)) + bc(raw["beta2"])
    y = elu(y)  # Dropout(0.5): identity in eval mode
    y = jax.lax.conv_general_dilated(y, raw["wp_oihw"], (1, 1), "VALID", dimension_numbers=dn)
    y = y + bc(raw["bp"])
    bb, e, hh, ww = y.shape
    return jnp.transpose(y, (0, 2, 3, 1)).reshape(bb, hh * ww, e)


# ---------------- main -------------------------------------------------------------------
if __name__ == "__main__":
    key = jax.random.PRNGKey(0)
    kx, kp = jax.random.split(key)
    x = jax.random.normal(kx, (B, 1, H_IN, W_IN), jnp.float32)
    kparams, raw = init_params(kp)

    out = jax.jit(patch_embedding_forward)(x, kparams)
    out = jax.block_until_ready(out)
    assert out.shape == (B, W_POOL, EMB), out.shape

    ref = jax.block_until_ready(reference_forward(x, raw))
    np.testing.assert_allclose(np.asarray(out), np.asarray(ref), rtol=5e-2, atol=5e-2)

    print("KERNEL_OK")
</pallas_src>

<mosaic_0001>
module attributes {stable_mosaic.version = 11 : i64} {
  func.func @_front_kernel(%arg0: i32, %arg1: memref<1x63x125xf32, #tpu.memory_space<vmem>>, %arg2: memref<125x440xf32, #tpu.memory_space<vmem>>, %arg3: memref<1x440xf32, #tpu.memory_space<vmem>>, %arg4: memref<1x63x440xbf16, #tpu.memory_space<vmem>>) attributes {dimension_semantics = [#tpu.dimension_semantics<parallel>], iteration_bounds = array<i64: 2>, scalar_prefetch = 0 : i64, scratch_operands = 0 : i64, tpu.core_type = #tpu.core_type<tc>, window_params = [{transform_indices = @transform_0, window_bounds = array<i64: 1, 63, 125>}, {pipeline_mode = #tpu.pipeline_mode<synchronous>, transform_indices = @transform_1, window_bounds = array<i64: 125, 440>}, {pipeline_mode = #tpu.pipeline_mode<synchronous>, transform_indices = @transform_2, window_bounds = array<i64: 1, 440>}, {transform_indices = @transform_3, window_bounds = array<i64: 1, 63, 440>}]} {
    %c0 = arith.constant 0 : index
    %c0_0 = arith.constant 0 : index
    %c0_1 = arith.constant 0 : index
    %0 = vector.load %arg1[%c0, %c0_0, %c0_1] : memref<1x63x125xf32, #tpu.memory_space<vmem>>, vector<1x63x125xf32>
    %1 = vector.shape_cast %0 : vector<1x63x125xf32> to vector<63x125xf32>
    %c0_2 = arith.constant 0 : index
    %c0_3 = arith.constant 0 : index
    %2 = vector.load %arg2[%c0_2, %c0_3] : memref<125x440xf32, #tpu.memory_space<vmem>>, vector<125x440xf32>
    %cst = arith.constant dense<0.000000e+00> : vector<63x440xf32>
    %3 = tpu.matmul %1, %2, %cst {dimension_numbers = #tpu.dot_dimension_numbers<[1], [0], [0], [1], [0, 0, 1, 1], [], []>} : vector<63x125xf32>, vector<125x440xf32>, vector<63x440xf32> -> vector<63x440xf32>
    %c0_4 = arith.constant 0 : index
    %c0_5 = arith.constant 0 : index
    %4 = vector.load %arg3[%c0_4, %c0_5] : memref<1x440xf32, #tpu.memory_space<vmem>>, vector<1x440xf32>
    %5 = vector.broadcast %4 : vector<1x440xf32> to vector<63x440xf32>
    %6 = arith.addf %3, %5 : vector<63x440xf32>
    %cst_6 = arith.constant 0.000000e+00 : f32
    %7 = vector.broadcast %cst_6 : f32 to vector<63x440xf32>
    %8 = arith.cmpf ogt, %6, %7 : vector<63x440xf32>
    %cst_7 = arith.constant 0.000000e+00 : f32
    %9 = vector.broadcast %cst_7 : f32 to vector<63x440xf32>
    %10 = arith.minimumf %6, %9 : vector<63x440xf32>
    %11 = math.exp %10 : vector<63x440xf32>
    %cst_8 = arith.constant 1.000000e+00 : f32
    %12 = vector.broadcast %cst_8 : f32 to vector<63x440xf32>
    %13 = arith.subf %11, %12 : vector<63x440xf32>
    %14 = arith.select %8, %6, %13 : vector<63x440xi1>, vector<63x440xf32>
    %15 = arith.truncf %14 : vector<63x440xf32> to vector<63x440xbf16>
    %c0_9 = arith.constant 0 : index
    %c0_10 = arith.constant 0 : index
    %c0_11 = arith.constant 0 : index
    %16 = vector.load %arg4[%c0_9, %c0_10, %c0_11] : memref<1x63x440xbf16, #tpu.memory_space<vmem>>, vector<1x63x440xbf16>
    %17 = vector.shape_cast %16 : vector<1x63x440xbf16> to vector<63x440xbf16>
    %18 = vector.shape_cast %15 : vector<63x440xbf16> to vector<1x63x440xbf16>
    tpu.vector_store %arg4[%c0_9, %c0_10, %c0_11], %18 {strides = array<i32>} : memref<1x63x440xbf16, #tpu.memory_space<vmem>>, vector<1x63x440xbf16>,
    return
  }
  func.func @transform_0(%arg0: i32) -> (i32, i32, i32) {
    %c0_i32 = arith.constant 0 : i32
    %c0_i32_0 = arith.constant 0 : i32
    %c0_i32_1 = arith.constant 0 : i32
    return %arg0, %c0_i32, %c0_i32_0 : i32, i32, i32
  }
  func.func @transform_1(%arg0: i32) -> (i32, i32) {
    %c0_i32 = arith.constant 0 : i32
    %c0_i32_0 = arith.constant 0 : i32
    %c0_i32_1 = arith.constant 0 : i32
    return %c0_i32, %c0_i32_0 : i32, i32
  }
  func.func @transform_2(%arg0: i32) -> (i32, i32) {
    %c0_i32 = arith.constant 0 : i32
    %c0_i32_0 = arith.constant 0 : i32
    %c0_i32_1 = arith.constant 0 : i32
    return %c0_i32, %c0_i32_0 : i32, i32
  }
  func.func @transform_3(%arg0: i32) -> (i32, i32, i32) {
    %c0_i32 = arith.constant 0 : i32
    %c0_i32_0 = arith.constant 0 : i32
    %c0_i32_1 = arith.constant 0 : i32
    return %arg0, %c0_i32, %c0_i32_0 : i32, i32, i32
  }
}

module attributes {stable_mosaic.version = 11 : i64} {
  func.func @_head_kernel(%arg0: i32, %arg1: memref<1x2520x11xbf16, #tpu.memory_space<vmem>>, %arg2: memref<40x2520xbf16, #tpu.memory_space<vmem>>, %arg3: memref<40x1xf32, #tpu.memory_space<vmem>>, %arg4: memref<40x40xf32, #tpu.memory_space<vmem>>, %arg5: memref<40x1xf32, #tpu.memory_space<vmem>>, %arg6: memref<1x40x11xf32, #tpu.memory_space<vmem>>) attributes {dimension_semantics = [#tpu.dimension_semantics<parallel>], iteration_bounds = array<i64: 2>, scalar_prefetch = 0 : i64, scratch_operands = 0 : i64, tpu.core_type = #tpu.core_type<tc>, window_params = [{transform_indices = @transform_0, window_bounds = array<i64: 1, 2520, 11>}, {pipeline_mode = #tpu.pipeline_mode<synchronous>, transform_indices = @transform_1, window_bounds = array<i64: 40, 2520>}, {pipeline_mode = #tpu.pipeline_mode<synchronous>, transform_indices = @transform_2, window_bounds = array<i64: 40, 1>}, {pipeline_mode = #tpu.pipeline_mode<synchronous>, transform_indices = @transform_3, window_bounds = array<i64: 40, 40>}, {pipeline_mode = #tpu.pipeline_mode<synchronous>, transform_indices = @transform_4, window_bounds = array<i64: 40, 1>}, {transform_indices = @transform_5, window_bounds = array<i64: 1, 40, 11>}]} {
    %c0 = arith.constant 0 : index
    %c0_0 = arith.constant 0 : index
    %c0_1 = arith.constant 0 : index
    %0 = vector.load %arg1[%c0, %c0_0, %c0_1] : memref<1x2520x11xbf16, #tpu.memory_space<vmem>>, vector<1x2520x11xbf16>
    %1 = vector.shape_cast %0 : vector<1x2520x11xbf16> to vector<2520x11xbf16>
    %c0_2 = arith.constant 0 : index
    %c0_3 = arith.constant 0 : index
    %2 = vector.load %arg2[%c0_2, %c0_3] : memref<40x2520xbf16, #tpu.memory_space<vmem>>, vector<40x2520xbf16>
    %cst = arith.constant dense<0.000000e+00> : vector<40x11xf32>
    %3 = tpu.matmul %2, %1, %cst {dimension_numbers = #tpu.dot_dimension_numbers<[1], [0], [0], [1], [0, 0, 1, 1], [], []>} : vector<40x2520xbf16>, vector<2520x11xbf16>, vector<40x11xf32> -> vector<40x11xf32>
    %c0_4 = arith.constant 0 : index
    %c0_5 = arith.constant 0 : index
    %4 = vector.load %arg3[%c0_4, %c0_5] : memref<40x1xf32, #tpu.memory_space<vmem>>, vector<40x1xf32>
    %5 = vector.broadcast %4 : vector<40x1xf32> to vector<40x11xf32>
    %6 = arith.addf %3, %5 : vector<40x11xf32>
    %cst_6 = arith.constant 0.000000e+00 : f32
    %7 = vector.broadcast %cst_6 : f32 to vector<40x11xf32>
    %8 = arith.cmpf ogt, %6, %7 : vector<40x11xf32>
    %cst_7 = arith.constant 0.000000e+00 : f32
    %9 = vector.broadcast %cst_7 : f32 to vector<40x11xf32>
    %10 = arith.minimumf %6, %9 : vector<40x11xf32>
    %11 = math.exp %10 : vector<40x11xf32>
    %cst_8 = arith.constant 1.000000e+00 : f32
    %12 = vector.broadcast %cst_8 : f32 to vector<40x11xf32>
    %13 = arith.subf %11, %12 : vector<40x11xf32>
    %14 = arith.select %8, %6, %13 : vector<40x11xi1>, vector<40x11xf32>
    %c0_9 = arith.constant 0 : index
    %c0_10 = arith.constant 0 : index
    %15 = vector.load %arg4[%c0_9, %c0_10] : memref<40x40xf32, #tpu.memory_space<vmem>>, vector<40x40xf32>
    %cst_11 = arith.constant dense<0.000000e+00> : vector<40x11xf32>
    %16 = tpu.matmul %15, %14, %cst_11 {dimension_numbers = #tpu.dot_dimension_numbers<[1], [0], [0], [1], [0, 0, 1, 1], [], []>} : vector<40x40xf32>, vector<40x11xf32>, vector<40x11xf32> -> vector<40x11xf32>
    %c0_12 = arith.constant 0 : index
    %c0_13 = arith.constant 0 : index
    %17 = vector.load %arg5[%c0_12, %c0_13] : memref<40x1xf32, #tpu.memory_space<vmem>>, vector<40x1xf32>
    %18 = vector.broadcast %17 : vector<40x1xf32> to vector<40x11xf32>
    %19 = arith.addf %16, %18 : vector<40x11xf32>
    %c0_14 = arith.constant 0 : index
    %c0_15 = arith.constant 0 : index
    %c0_16 = arith.constant 0 : index
    %20 = vector.load %arg6[%c0_14, %c0_15, %c0_16] : memref<1x40x11xf32, #tpu.memory_space<vmem>>, vector<1x40x11xf32>
    %21 = vector.shape_cast %20 : vector<1x40x11xf32> to vector<40x11xf32>
    %22 = vector.shape_cast %19 : vector<40x11xf32> to vector<1x40x11xf32>
    tpu.vector_store %arg6[%c0_14, %c0_15, %c0_16], %22 {strides = array<i32>} : memref<1x40x11xf32, #tpu.memory_space<vmem>>, vector<1x40x11xf32>,
    return
  }
  func.func @transform_0(%arg0: i32) -> (i32, i32, i32) {
    %c0_i32 = arith.constant 0 : i32
    %c0_i32_0 = arith.constant 0 : i32
    %c0_i32_1 = arith.constant 0 : i32
    return %arg0, %c0_i32, %c0_i32_0 : i32, i32, i32
  }
  func.func @transform_1(%arg0: i32) -> (i32, i32) {
    %c0_i32 = arith.constant 0 : i32
    %c0_i32_0 = arith.constant 0 : i32
    %c0_i32_1 = arith.constant 0 : i32
    return %c0_i32, %c0_i32_0 : i32, i32
  }
  func.func @transform_2(%arg0: i32) -> (i32, i32) {
    %c0_i32 = arith.constant 0 : i32
    %c0_i32_0 = arith.constant 0 : i32
    %c0_i32_1 = arith.constant 0 : i32
    return %c0_i32, %c0_i32_0 : i32, i32
  }
  func.func @transform_3(%arg0: i32) -> (i32, i32) {
    %c0_i32 = arith.constant 0 : i32
    %c0_i32_0 = arith.constant 0 : i32
    %c0_i32_1 = arith.constant 0 : i32
    return %c0_i32, %c0_i32_0 : i32, i32
  }
  func.func @transform_4(%arg0: i32) -> (i32, i32) {
    %c0_i32 = arith.constant 0 : i32
    %c0_i32_0 = arith.constant 0 : i32
    %c0_i32_1 = arith.constant 0 : i32
    return %c0_i32, %c0_i32_0 : i32, i32
  }
  func.func @transform_5(%arg0: i32) -> (i32, i32, i32) {
    %c0_i32 = arith.constant 0 : i32
    %c0_i32_0 = arith.constant 0 : i32
    %c0_i32_1 = arith.constant 0 : i32
    return %arg0, %c0_i32, %c0_i32_0 : i32, i32, i32
  }
}

</mosaic_0001>

<bundles_post_ra>
// kernel: patch_embedding_forward.2
= control target key start
LH: loop header
LB: loop body
LE: loop exit
PB: predicated region body
PF: predicated region fallthrough
CT: control target
= control target key end

     0   :  { %8 = vsyncpa [#allocation3], 0  ;;  %s1245_s12 = smov 0   ;;  %s1871_s0 = inlined_call_operand.vmem [shape: f32[2,63,125], index: 0, kind: input, shape index: {}]   ;;  %s1872_s1 = inlined_call_operand.vmem [shape: f32[125,440], index: 1, kind: input, shape index: {}]   ;;  %s1873_s2 = inlined_call_operand.hbm [shape: f32[1,440], index: 2, kind: input, shape index: {}]   ;;  %s1874_s3 = inlined_call_operand.vmem [shape: bf16[2,63,440], index: 3, kind: output, shape index: {}]  }
   0x1 LB: > { %s1251_s13 = sadd.s32 4294967295, %s1220_s12   ;;  %p932_p0 = scmp.ge.s32.totalorder %s1220_s12, 1  ;;  %s1220_s12 = sphi %s1245_s12, %s14_s12  }
   0x2   : > { %p113_p1 = scmp.lt.s32.totalorder %s1220_s12, 3  ;;  %p1875_p3 = scmp.eq.s32.totalorder %s1251_s13, 0 }
   0x3   : > { %s1222_s15 = smov [#allocation2]   ;;  %s1182_s20 = scalar_lea.hbm %s1873_s2, 64 }
   0x4   : > { %p1255_p2 = pnand %p932_p0, %p113_p1  ;;  %s129_s16 = sshll.u32 %s1222_s15, 4  ;;  %s130_s16 = int_to_ptr.vmem [resolvable:$true] %s129_s16 }
   0x5   : > { %p1183_p6 = scmp.ne.s32.totalorder %s1873_s2, %s1182_s20  ;;  %p1189_p10 = scmp.lt.u32.totalorder %s1182_s20, %s1873_s2 }
   0x6   : > { %s1877_s14 = scalar_select %p1255_p2, 1, 0 }
   0x7   : > { %p1101_p4 = pneg %p1255_p2 }
   0x9   : > { %p1264_p5 = pnand %p1875_p3, %p1101_p4 }
   0xb   : > { %p1184_p7 = pneg %p1264_p5 }
   0xd   : > { %p1185_p8 = pnand %p1184_p7, %p1183_p6 }
   0xf   : > { %p1186_p9 = pneg %p1185_p8 }
  0x11   : > { %p1191_p11 = pnand %p1189_p10, %p1186_p9 }
  0x13   : > { %1194 = shalt.err (!%p1191_p11)
}
  0x14   : > { %s1195_s25 = scalar_lea.vmem %s130_s16, 64  ;;  %p1203_p1 = scmp.lt.s32.totalorder %s130_s16, %s130_s16 }
  0x15   : > { %p1196_p12 = scmp.ne.s32.totalorder %s130_s16, %s1195_s25  ;;  %p1204_p4 = scmp.lt.s32.totalorder %s1195_s25, %s1195_s25 }
  0x17   : > { %p1198_p13 = pnand %p1196_p12, %p1184_p7  ;;  %p1205_p3 = por %p1204_p4, %p1203_p1 }
  0x19   : > { %p1199_p0 = pneg %p1198_p13 }
  0x1b   : > { %p1206_p2 = pnand %p1205_p3, %p1199_p0 }
  0x1d   : > { %1209 = shalt.err (!%p1206_p2)
}
  0x1e   : > { %1104 = dma.hbm_to_vmem [thread:$0]  (!%p1264_p5), %s1873_s2, 64, %s130_s16, [#allocation3]  }
  0x1f   : > { %p1879_p6 = scmp.ne.s32.totalorder %s1877_s14, 0 }
  0x20   : > { %p1880_p8 = scmp.eq.s32.totalorder (!%p1879_p6), %s1251_s13, 0 }
  0x21   : > { %150 = sbr.rel (%p1879_p6) target bundleno = 362 (0x16a), region = 32 }
  0x28   : > { %1215 = dma.done.wait (%p1880_p8), [#allocation3], 64   ;;  %p1881_p7 = pmov %p1880_p8 }
  0x29   : > { %v1223_v0 = vmov 0.0   ;;  %v193_v1 = vld [vmem:[%s1872_s1 + $0x8] sm:$0xff]  ;;  %v195_v3 = vld [vmem:[%s1872_s1 + $0x18] sm:$0xff]  ;;  %v192_v6 = vld [vmem:[%s1872_s1] sm:$0xff]  ;;  %p174_p2 = scmp.lt.s32.totalorder %s1251_s13, 1  ;;  %vm303_vm0 = vcmask 1044480  }
  0x2a   : > { %1217 = vsyncadd (%p1881_p7), [#allocation3], 4294967232  ;;  %380 = vmatprep.mubr.f32.mxu0 %v1223_v0  ;;  %493 = vmatprep.mubr.f32.mxu1 %v1223_v0  ;;  %v197_v2 = vld [vmem:[%s1872_s1 + $0x28] sm:$0xff]  ;;  %v199_v5 = vld [vmem:[%s1872_s1 + $0x38] sm:$0xff]  ;;  %vm1224_vm1 = vmmov 1   ;;  %vm278_vm3 = vcmask 1022976  }
  0x2b   : > { %v1029_v4 = vpack.c.bf16 %v197_v2, %v193_v1  ;;  %v196_v7 = vld [vmem:[%s1872_s1 + $0x20] sm:$0xff]  ;;  %v1063_v8 = vpack.c.bf16 %v199_v5, %v195_v3  ;;  %v194_v10 = vld [vmem:[%s1872_s1 + $0x10] sm:$0xff]  ;;  %v201_v12 = vld [vmem:[%s1872_s1 + $0x48] sm:$0xff]  ;;  %s1889_s13 = smov (!%p174_p2, %s1251_s13), 1  ;;  %vm831_vm6 = vcmask 1043456   ;;  %vm832_vm7 = vcmask 457732  }
  0x2c   : > { %v1031_v9 = vpack.c.bf16 %v196_v7, %v192_v6  ;;  %v198_v11 = vld [vmem:[%s1872_s1 + $0x30] sm:$0xff]  ;;  %v205_v14 = vld [vmem:[%s1872_s1 + $0x68] sm:$0xff]  ;;  %v203_v15 = vld [vmem:[%s1872_s1 + $0x58] sm:$0xff]  ;;  %s1011_s4 = sshll.u32 %s1889_s13, 6  ;;  %s1012_s8 = sshll.u32 %s1889_s13, 7 }
  0x2d   : > { %1030 = vmatprep.subr.bf16.mxu0 %v1029_v4  ;;  %v1065_v13 = vpack.c.bf16 %v198_v11, %v194_v10  ;;  %v207_v16 = vld [vmem:[%s1872_s1 + $0x78] sm:$0xff]  ;;  %1064 = vmatprep.subr.bf16.mxu1 %v1063_v8  ;;  %v1033_v17 = vpack.c.bf16 %v205_v14, %v201_v12  ;;  %v200_v19 = vld [vmem:[%s1872_s1 + $0x40] sm:$0xff]  ;;  %v202_v21 = vld [vmem:[%s1872_s1 + $0x50] sm:$0xff]  ;;  %s1494_s7 = scalar_lea.vmem %s1871_s0, %s1011_s4  ;;  %s1632_s10 = scalar_lea.vmem %s1874_s3, %s1012_s8 }
  0x2e   : > { %1032 = vmatpush1.bf16.msra.mxu0 %v1031_v9  ;;  %v1067_v18 = vpack.c.bf16 %v207_v16, %v203_v15  ;;  %v204_v20 = vld [vmem:[%s1872_s1 + $0x60] sm:$0xff]  ;;  %v206_v23 = vld [vmem:[%s1872_s1 + $0x70] sm:$0xff]  ;;  %v209_v24 = vld [vmem:[%s1872_s1 + $0x88] sm:$0xff] }
  0x2f   : > { %1066 = vmatpush1.bf16.msra.mxu1 %v1065_v13  ;;  %v1035_v22 = vpack.c.bf16 %v204_v20, %v200_v19  ;;  %v213_v25 = vld [vmem:[%s1872_s1 + $0xa8] sm:$0xff]  ;;  %1034 = vmatprep.subr.bf16.mxu0 %v1033_v17  ;;  %v1069_v26 = vpack.c.bf16 %v206_v23, %v202_v21  ;;  %v211_v28 = vld [vmem:[%s1872_s1 + $0x98] sm:$0xff]  ;;  %v208_v30 = vld [vmem:[%s1872_s1 + $0x80] sm:$0xff] }
  0x30   : > { %1068 = vmatprep.subr.bf16.mxu1 %v1067_v18  ;;  %v1037_v27 = vpack.c.bf16 %v213_v25, %v209_v24  ;;  %v215_v29 = vld [vmem:[%s1872_s1 + $0xb8] sm:$0xff]  ;;  %v212_v32 = vld [vmem:[%s1872_s1 + $0xa0] sm:$0xff]  ;;  %v210_v33 = vld [vmem:[%s1872_s1 + $0x90] sm:$0xff] }
  0x31   : > { %v1071_v31 = vpack.c.bf16 %v215_v29, %v211_v28  ;;  %v214_v34 = vld [vmem:[%s1872_s1 + $0xb0] sm:$0xff]  ;;  %v1039_v35 = vpack.c.bf16 %v212_v32, %v208_v30  ;;  %v217_v36 = vld [vmem:[%s1872_s1 + $0xc8] sm:$0xff]  ;;  %v219_v38 = vld [vmem:[%s1872_s1 + $0xd8] sm:$0xff] }
  0x32   : > { %1036 = vmatpush1.bf16.msra.mxu0 %v1035_v22  ;;  %v221_v37 = vld [vmem:[%s1872_s1 + $0xe8] sm:$0xff]  ;;  %v1073_v39 = vpack.c.bf16 %v214_v34, %v210_v33  ;;  %v223_v41 = vld [vmem:[%s1872_s1 + $0xf8] sm:$0xff]  ;;  %v216_v42 = vld [vmem:[%s1872_s1 + $0xc0] sm:$0xff] }
  0x33   : > { %1070 = vmatpush1.bf16.msra.mxu1 %v1069_v26  ;;  %1038 = vmatprep.subr.bf16.mxu0 %v1037_v27  ;;  %v1041_v40 = vpack.c.bf16 %v221_v37, %v217_v36  ;;  %v220_v43 = vld [vmem:[%s1872_s1 + $0xe0] sm:$0xff]  ;;  %v1075_v44 = vpack.c.bf16 %v223_v41, %v219_v38  ;;  %v218_v45 = vld [vmem:[%s1872_s1 + $0xd0] sm:$0xff]  ;;  %v225_v47 = vld [vmem:[%s1872_s1 + $0x108] sm:$0xff] }
  0x34   : > { %1072 = vmatprep.subr.bf16.mxu1 %v1071_v31  ;;  %v222_v46 = vld [vmem:[%s1872_s1 + $0xf0] sm:$0xff]  ;;  %v229_v48 = vld [vmem:[%s1872_s1 + $0x128] sm:$0xff]  ;;  %v227_v49 = vld [vmem:[%s1872_s1 + $0x118] sm:$0xff]  ;;  %v1043_v51 = vpack.c.bf16 %v220_v43, %v216_v42  ;;  %v258_v42 = vlaneseq }
  0x35   : > { %v231_v50 = vld [vmem:[%s1872_s1 + $0x138] sm:$0xff]  ;;  %v1077_v52 = vpack.c.bf16 %v222_v46, %v218_v45  ;;  %v1045_v53 = vpack.c.bf16 %v229_v48, %v225_v47  ;;  %v224_v54 = vld [vmem:[%s1872_s1 + $0x100] sm:$0xff]  ;;  %v226_v56 = vld [vmem:[%s1872_s1 + $0x110] sm:$0xff] }
  0x36   : > { %1040 = vmatpush1.bf16.msra.mxu0 %v1039_v35  ;;  %v228_v55 = vld [vmem:[%s1872_s1 + $0x120] sm:$0xff]  ;;  %v1079_v57 = vpack.c.bf16 %v231_v50, %v227_v49  ;;  %v230_v58 = vld [vmem:[%s1872_s1 + $0x130] sm:$0xff]  ;;  %v233_v59 = vld [vmem:[%s1872_s1 + $0x148] sm:$0xff]  ;;  %v259_v43 = vshrl.u32 %v258_v42, 7 }
  0x37   : > { %1074 = vmatpush1.bf16.msra.mxu1 %v1073_v39  ;;  %1042 = vmatprep.subr.bf16.mxu0 %v1041_v40  ;;  %v237_v60 = vld [vmem:[%s1872_s1 + $0x168] sm:$0xff]  ;;  %v235_v61 = vld [vmem:[%s1872_s1 + $0x158] sm:$0xff]  ;;  %v1047_v63 = vpack.c.bf16 %v228_v55, %v224_v54  ;;  %v1081_v1 = vpack.c.bf16 %v230_v58, %v226_v56  ;;  %v232_v3 = vld [vmem:[%s1872_s1 + $0x140] sm:$0xff] }
  0x38   : > { %1076 = vmatprep.subr.bf16.mxu1 %v1075_v44  ;;  %v239_v62 = vld [vmem:[%s1872_s1 + $0x178] sm:$0xff]  ;;  %v1049_v2 = vpack.c.bf16 %v237_v60, %v233_v59  ;;  %v236_v4 = vld [vmem:[%s1872_s1 + $0x160] sm:$0xff]  ;;  %v234_v5 = vld [vmem:[%s1872_s1 + $0x150] sm:$0xff]  ;;  %v260_v44 = vsub.s32 0, %v259_v43  ;;  %v268_v46 = vsub.s32 2, %v259_v43  ;;  %v264_v47 = vsub.s32 1, %v259_v43 }
  0x39   : > { %v1083_v6 = vpack.c.bf16 %v239_v62, %v235_v61  ;;  %v238_v7 = vld [vmem:[%s1872_s1 + $0x170] sm:$0xff]  ;;  %v241_v8 = vld [vmem:[%s1872_s1 + $0x188] sm:$0xff]  ;;  %v243_v10 = vld [vmem:[%s1872_s1 + $0x198] sm:$0xff]  ;;  %v1051_v12 = vpack.c.bf16 %v236_v4, %v232_v3  ;;  %v272_v48 = vsub.s32 3, %v259_v43 }
  0x3a   : > { %1044 = vmatpush1.bf16.msra.mxu0 %v1043_v51  ;;  %v245_v9 = vld [vmem:[%s1872_s1 + $0x1a8] sm:$0xff]  ;;  %v247_v11 = vld [vmem:[%s1872_s1 + $0x1b8] sm:$0xff]  ;;  %v1085_v13 = vpack.c.bf16 %v238_v7, %v234_v5  ;;  %v240_v15 = vld [vmem:[%s1872_s1 + $0x180] sm:$0xff] }
  0x3b   : > { %1078 = vmatpush1.bf16.msra.mxu1 %v1077_v52  ;;  %1046 = vmatprep.subr.bf16.mxu0 %v1045_v53  ;;  %v1053_v14 = vpack.c.bf16 %v245_v9, %v241_v8  ;;  %v244_v16 = vld [vmem:[%s1872_s1 + $0x1a0] sm:$0xff]  ;;  %v242_v17 = vld [vmem:[%s1872_s1 + $0x190] sm:$0xff]  ;;  %v1087_v18 = vpack.c.bf16 %v247_v11, %v243_v10  ;;  %v249_v20 = vld [vmem:[%s1872_s1 + $0x1c8] sm:$0xff] }
  0x3c   : > { %1080 = vmatprep.subr.bf16.mxu1 %v1079_v57  ;;  %v246_v19 = vld [vmem:[%s1872_s1 + $0x1b0] sm:$0xff]  ;;  %v253_v21 = vld [vmem:[%s1872_s1 + $0x1e8] sm:$0x1f]  ;;  %v251_v22 = vld [vmem:[%s1872_s1 + $0x1d8] sm:$0xff]  ;;  %v1055_v24 = vpack.c.bf16 %v244_v16, %v240_v15 }
  0x3d   : > { %v255_v23 = vld [vmem:[%s1872_s1 + $0x1f8] sm:$0x1f]  ;;  %v1089_v25 = vpack.c.bf16 %v246_v19, %v242_v17  ;;  %v1057_v26 = vpack.c.bf16 %v253_v21, %v249_v20  ;;  %v248_v27 = vld [vmem:[%s1872_s1 + $0x1c0] sm:$0xff]  ;;  %vm1058_vm2 = vmpackc.low %vm303_vm0, %vm1224_vm1 }
  0x3e   : > { %1048 = vmatpush1.bf16.msra.mxu0 %v1047_v63  ;;  %v252_v28 = vld [vmem:[%s1872_s1 + $0x1e0] sm:$0x1f]  ;;  %v1091_v29 = vpack.c.bf16 %v255_v23, %v251_v22  ;;  %v250_v30 = vld [vmem:[%s1872_s1 + $0x1d0] sm:$0xff]  ;;  %v185_v35 = vld [vmem:[%s1494_s7 + $0x8] sm:$0xff] }
  0x3f   : > { %1082 = vmatpush1.bf16.msra.mxu1 %v1081_v1  ;;  %1050 = vmatprep.subr.bf16.mxu0 %v1049_v2  ;;  %v254_v31 = vld [vmem:[%s1872_s1 + $0x1f0] sm:$0x1f]  ;;  %v1060_v32 = vpack.c.bf16 %v252_v28, %v248_v27  ;;  %v184_v34 = vld [vmem:[%s1494_s7] sm:$0xff]  ;;  %v187_v37 = vld [vmem:[%s1494_s7 + $0x18] sm:$0xff] }
  0x40   : > { %1084 = vmatprep.subr.bf16.mxu1 %v1083_v6  ;;  %v1094_v33 = vpack.c.bf16 %v254_v31, %v250_v30  ;;  %v186_v36 = vld [vmem:[%s1494_s7 + $0x10] sm:$0xff]  ;;  %v188_v38 = vld [vmem:[%s1494_s7 + $0x20] sm:$0xff]  ;;  %v189_v39 = vld [vmem:[%s1494_s7 + $0x28] sm:$0xff] }
  0x41   : > { %v190_v40 = vld [vmem:[%s1494_s7 + $0x30] sm:$0xff]  ;;  %v191_v41 = vld [vmem:[%s1494_s7 + $0x38] sm:$0x7f]  ;;  %v256_v45 = vld [vmem:[#allocation2] sm:$0xf] }
  0x42   : > { %1052 = vmatpush1.bf16.msra.mxu0 %v1051_v12  ;;  %v1534_v49 = vrot.slane %v256_v45, %v260_v44  ;;  %v1536_v50 = vrot.slane %v256_v45, %v268_v46  ;;  %v1538_v51 = vrot.slane %v256_v45, %v264_v47  ;;  %v1540_v52 = vrot.slane %v256_v45, %v272_v48  ;;  %vm1645_vm14 = vmor %vm832_vm7, %vm831_vm6 }
  0x43   : > { %1086 = vmatpush1.bf16.msra.mxu1 %v1085_v13  ;;  %1054 = vmatprep.subr.bf16.mxu0 %v1053_v14 }
  0x44   : > { %1088 = vmatprep.subr.bf16.mxu1 %v1087_v18 }
  0x46   : > { %1056 = vmatpush1.bf16.msra.mxu0 %v1055_v24 }
  0x47   : > { %1090 = vmatpush1.bf16.msra.mxu1 %v1089_v25  ;;  %1059 = vmatprep.subr.msk.bf16.mxu0 %vm1058_vm2, %v1057_v26 }
  0x48   : > { %1093 = vmatprep.subr.msk.bf16.mxu1 %vm1058_vm2, %v1091_v29 }
  0x4a   : > { %1062 = vmatpush1.bf16.msk.msra.mxu0 %vm1058_vm2, %v1060_v32 }
  0x4b   : > { %1096 = vmatpush1.bf16.msk.msra.mxu1 %vm1058_vm2, %v1094_v33 }
  0x4d   : > { %943 = vmatmul.mubr.msk.f32.vlgmr.msra.gmra.mrb[0].mxu0 %vm278_vm3, %v184_v34 }
  0x4e   : > { %953 = vmatmul.mubr.msk.f32.vlgmr.msra.gmra.mrb[0].mxu1 %vm278_vm3, %v184_v34  ;;  %386 = vmatprep.mubr.f32.mxu0 %v1223_v0 }
  0x4f   : > { %499 = vmatprep.mubr.f32.mxu1 %v1223_v0 }
  0x51   : > { %944 = vmatmul.mubr.msk.f32.gmra.mrb[2].mxu0 %vm278_vm3, %v185_v35 }
  0x52   : > { %954 = vmatmul.mubr.msk.f32.gmra.mrb[2].mxu1 %vm278_vm3, %v185_v35  ;;  %392 = vmatprep.mubr.f32.mxu0 %v1223_v0 }
  0x53   : > { %505 = vmatprep.mubr.f32.mxu1 %v1223_v0 }
  0x55   : > { %945 = vmatmul.mubr.msk.f32.gmra.mrb[4].mxu0 %vm278_vm3, %v186_v36 }
  0x56   : > { %955 = vmatmul.mubr.msk.f32.gmra.mrb[4].mxu1 %vm278_vm3, %v186_v36  ;;  %398 = vmatprep.mubr.f32.mxu0 %v1223_v0 }
  0x57   : > { %511 = vmatprep.mubr.f32.mxu1 %v1223_v0 }
  0x59   : > { %946 = vmatmul.mubr.msk.f32.gmra.mrb[6].mxu0 %vm278_vm3, %v187_v37 }
  0x5a   : > { %956 = vmatmul.mubr.msk.f32.gmra.mrb[6].mxu1 %vm278_vm3, %v187_v37  ;;  %404 = vmatprep.mubr.f32.mxu0 %v1223_v0 }
  0x5b   : > { %517 = vmatprep.mubr.f32.mxu1 %v1223_v0 }
  0x5d   : > { %947 = vmatmul.mubr.msk.f32.gmra.mrb[8].mxu0 %vm278_vm3, %v188_v38 }
  0x5e   : > { %957 = vmatmul.mubr.msk.f32.gmra.mrb[8].mxu1 %vm278_vm3, %v188_v38  ;;  %410 = vmatprep.mubr.f32.mxu0 %v1223_v0 }
  0x5f   : > { %523 = vmatprep.mubr.f32.mxu1 %v1223_v0 }
  0x61   : > { %948 = vmatmul.mubr.msk.f32.gmra.mrb[10].mxu0 %vm278_vm3, %v189_v39 }
  0x62   : > { %958 = vmatmul.mubr.msk.f32.gmra.mrb[10].mxu1 %vm278_vm3, %v189_v39  ;;  %416 = vmatprep.mubr.f32.mxu0 %v1223_v0 }
  0x63   : > { %529 = vmatprep.mubr.f32.mxu1 %v1223_v0 }
  0x65   : > { %949 = vmatmul.mubr.msk.f32.gmra.mrb[12].mxu0 %vm278_vm3, %v190_v40 }
  0x66   : > { %959 = vmatmul.mubr.msk.f32.gmra.mrb[12].mxu1 %vm278_vm3, %v190_v40  ;;  %422 = vmatprep.mubr.f32.mxu0 %v1223_v0 }
  0x67   : > { %535 = vmatprep.mubr.f32.mxu1 %v1223_v0 }
  0x69   : > { %950 = vmatmul.mubr.msk.f32.gmra.mrb[14].mxu0 %vm278_vm3, %v191_v41 }
  0x6a   : > { %960 = vmatmul.mubr.msk.f32.gmra.mrb[14].mxu1 %vm278_vm3, %v191_v41 }
 0x120   : > { %v382_v0 = vpop.f32.mrb[0].mxu0 }
 0x121   : > { %v1543_v53 = vadd.f32 %v382_v0, %v1534_v49  ;;  %v495_v54 = vpop.f32.mrb[0].mxu1  ;;  %v384_v55 = vpop.f32.mrb[1].mxu0 }
 0x122   : > { %v1546_v56 = vadd.f32 %v495_v54, %v1536_v50  ;;  %v1549_v57 = vadd.f32 %v384_v55, %v1538_v51  ;;  %v497_v58 = vpop.f32.mrb[1].mxu1 }
 0x123   : > { %v574_v59 = vmin.f32 %v1543_v53, 0.0  ;;  %v1553_v60 = vadd.f32 %v497_v58, %v1540_v52  ;;  %vm542_vm4 = vcmp.gt.f32.partialorder %v1543_v53, 0.0 }
 0x124   : > { %v576_v61 = vmin.f32 %v1546_v56, 0.0  ;;  %v575_v62 = vmin.f32 %v1549_v57, 0.0  ;;  %v388_v63 = vpop.f32.mrb[2].mxu0  ;;  %vm544_vm5 = vcmp.gt.f32.partialorder %v1546_v56, 0.0  ;;  %vm543_vm8 = vcmp.gt.f32.partialorder %v1549_v57, 0.0 }
 0x125   : > { %v606_v1 = vmul.f32 1.442695, %v574_v59  ;;  %v577_v2 = vmin.f32 %v1553_v60, 0.0  ;;  %v1559_v3 = vadd.f32 %v388_v63, %v1534_v49  ;;  %v501_v4 = vpop.f32.mrb[2].mxu1  ;;  %v390_v5 = vpop.f32.mrb[3].mxu0  ;;  %vm545_vm9 = vcmp.gt.f32.partialorder %v1553_v60, 0.0 }
 0x126   : > { %v610_v6 = vmul.f32 1.442695, %v576_v61  ;;  %v608_v7 = vmul.f32 1.442695, %v575_v62  ;;  %v1562_v8 = vadd.f32 %v501_v4, %v1536_v50  ;;  %v1565_v9 = vadd.f32 %v390_v5, %v1538_v51  ;;  %v503_v10 = vpop.f32.mrb[3].mxu1 }
 0x127   : > { %1118 = vpow2.f32 %v606_v1  ;;  %v612_v11 = vmul.f32 1.442695, %v577_v2  ;;  %v578_v12 = vmin.f32 %v1559_v3, 0.0  ;;  %v1571_v17 = vadd.f32 %v503_v10, %v1540_v52 }
 0x128   : > { %1120 = vpow2.f32 %v610_v6  ;;  %v580_v13 = vmin.f32 %v1562_v8, 0.0  ;;  %v394_v14 = vpop.f32.mrb[4].mxu0  ;;  %v579_v16 = vmin.f32 %v1565_v9, 0.0  ;;  %vm546_vm10 = vcmp.gt.f32.partialorder %v1559_v3, 0.0 }
 0x129   : > { %1122 = vpow2.f32 %v608_v7  ;;  %v614_v15 = vmul.f32 1.442695, %v578_v12  ;;  %v507_v18 = vpop.f32.mrb[4].mxu1  ;;  %v396_v19 = vpop.f32.mrb[5].mxu0  ;;  %v1574_v21 = vadd.f32 %v394_v14, %v1534_v49  ;;  %v581_v25 = vmin.f32 %v1571_v17, 0.0 }
 0x12a   : > { %1124 = vpow2.f32 %v612_v11  ;;  %v618_v20 = vmul.f32 1.442695, %v580_v13  ;;  %v1577_v22 = vadd.f32 %v507_v18, %v1536_v50  ;;  %v509_v23 = vpop.f32.mrb[5].mxu1  ;;  %v616_v24 = vmul.f32 1.442695, %v579_v16 }
 0x12b   : > { %1126 = vpow2.f32 %v614_v15  ;;  %v582_v26 = vmin.f32 %v1574_v21, 0.0  ;;  %v620_v28 = vmul.f32 1.442695, %v581_v25  ;;  %v1585_v30 = vadd.f32 %v396_v19, %v1538_v51 }
 0x12c   : > { %1128 = vpow2.f32 %v618_v20  ;;  %v400_v27 = vpop.f32.mrb[6].mxu0  ;;  %v584_v29 = vmin.f32 %v1577_v22, 0.0  ;;  %v1588_v34 = vadd.f32 %v509_v23, %v1540_v52  ;;  %vm548_vm11 = vcmp.gt.f32.partialorder %v1562_v8, 0.0 }
 0x12d   : > { %1130 = vpow2.f32 %v616_v24  ;;  %v513_v31 = vpop.f32.mrb[6].mxu1  ;;  %v402_v32 = vpop.f32.mrb[7].mxu0  ;;  %v622_v33 = vmul.f32 1.442695, %v582_v26  ;;  %v1591_v35 = vadd.f32 %v400_v27, %v1534_v49  ;;  %v583_v39 = vmin.f32 %v1585_v30, 0.0 }
 0x12e   : > { %v1594_v36 = vadd.f32 %v513_v31, %v1536_v50  ;;  %v515_v37 = vpop.f32.mrb[7].mxu1  ;;  %1132 = vpow2.f32 %v620_v28  ;;  %v626_v38 = vmul.f32 1.442695, %v584_v29  ;;  %v585_v40 = vmin.f32 %v1588_v34, 0.0 }
 0x12f   : > { %1134 = vpow2.f32 %v622_v33  ;;  %vm547_vm12 = vcmp.gt.f32.partialorder %v1565_v9, 0.0  ;;  %v624_v43 = vmul.f32 1.442695, %v583_v39  ;;  %v586_v44 = vmin.f32 %v1591_v35, 0.0 }
 0x130   : > { %v406_v41 = vpop.f32.mrb[8].mxu0  ;;  %1136 = vpow2.f32 %v626_v38  ;;  %v628_v0 = vmul.f32 1.442695, %v585_v40  ;;  %v588_v54 = vmin.f32 %v1594_v36, 0.0  ;;  %v1608_v55 = vadd.f32 %v402_v32, %v1538_v51 }
 0x131   : > { %v1119_v42 = vpop.eup %1118  ;;  %v519_v45 = vpop.f32.mrb[8].mxu1  ;;  %vm549_vm13 = vcmp.gt.f32.partialorder %v1571_v17, 0.0  ;;  %1138 = vpow2.f32 %v624_v43  ;;  %v630_v62 = vmul.f32 1.442695, %v586_v44  ;;  %v1623_v11 = vadd.f32 %v515_v37, %v1540_v52 }
 0x132   : > { %v1604_v46 = vpop.f32.mrb[9].mxu0  ;;  %v1121_v47 = vpop.eup %1120  ;;  %v961_v48 = vadd.f32 -1.0, %v1119_v42  ;;  %1140 = vpow2.f32 %v628_v0  ;;  %v634_v4 = vmul.f32 1.442695, %v588_v54  ;;  %v587_v15 = vmin.f32 %v1608_v55, 0.0 }
 0x133   : > { %v1610_v58 = vpop.f32.mrb[9].mxu1  ;;  %v1123_v59 = vpop.eup %1122  ;;  %v963_v61 = vadd.f32 -1.0, %v1121_v47  ;;  %1142 = vpow2.f32 %v630_v62  ;;  %vm550_vm15 = vcmp.gt.f32.partialorder %v1574_v21, 0.0  ;;  %vm552_vm0 = vcmp.gt.f32.partialorder %v1577_v22, 0.0 }
 0x134   : > { %v1125_v63 = vpop.eup %1124  ;;  %v702_v1 = vsel %vm542_vm4, %v1543_v53, %v961_v48  ;;  %v962_v2 = vadd.f32 -1.0, %v1123_v59  ;;  %v1617_v5 = vpop.f32.mrb[10].mxu0  ;;  %1144 = vpow2.f32 %v634_v4  ;;  %v632_v27 = vmul.f32 1.442695, %v587_v15 }
 0x135   : > { %v1127_v6 = vpop.eup %1126  ;;  %v704_v7 = vsel %vm544_vm5, %v1546_v56, %v963_v61  ;;  %v964_v10 = vadd.f32 -1.0, %v1125_v63  ;;  %v1625_v12 = vpop.f32.mrb[10].mxu1  ;;  %v589_v29 = vmin.f32 %v1623_v11, 0.0  ;;  %v1659_v31 = vadd.f32 %v406_v41, %v1534_v49 }
 0x136   : > { %v1627_v13 = vpop.f32.mrb[11].mxu0  ;;  %v1129_v53 = vpop.eup %1128  ;;  %v703_v14 = vsel %vm543_vm8, %v1549_v57, %v962_v2  ;;  %v965_v56 = vadd.f32 -1.0, %v1127_v6  ;;  %v1662_v32 = vadd.f32 %v519_v45, %v1536_v50  ;;  %1146 = vpow2.f32 %v632_v27 }
 0x137   : > { %v1638_v16 = vpop.f32.mrb[11].mxu1  ;;  %v1131_v18 = vpop.eup %1130  ;;  %v1013_v19 = vpack.c.bf16 %v703_v14, %v702_v1  ;;  %v705_v20 = vsel %vm545_vm9, %v1553_v60, %v964_v10  ;;  %v967_v57 = vadd.f32 -1.0, %v1129_v53  ;;  %v636_v45 = vmul.f32 1.442695, %v589_v29 }
 0x138   : > { %v1014_v24 = vpack.c.bf16 %v705_v20, %v704_v7  ;;  %v706_v25 = vsel %vm546_vm10, %v1559_v3, %v965_v56  ;;  %v966_v26 = vadd.f32 -1.0, %v1131_v18  ;;  %v1653_v28 = vpop.f32.mrb[12].mxu0  ;;  %v1133_v60 = vpop.eup %1132  ;;  %v1681_v47 = vadd.f32 %v1604_v46, %v1538_v51 }
 0x139   : > { %830 = vst [vmem:[%s1632_s10] sm:$0xff] %v1013_v19  ;;  %v1664_v33 = vpop.f32.mrb[12].mxu1  ;;  %v1666_v37 = vpop.f32.mrb[13].mxu0  ;;  %v708_v38 = vsel %vm548_vm11, %v1562_v8, %v967_v57  ;;  %v968_v40 = vadd.f32 -1.0, %v1133_v60  ;;  %vm551_vm1 = vcmp.gt.f32.partialorder %v1585_v30, 0.0  ;;  %vm553_vm2 = vcmp.gt.f32.partialorder %v1588_v34, 0.0 }
 0x13a   : > { %v1135_v3 = vpop.eup %1134  ;;  %834 = vst.msk [vmem:[%s1632_s10 + $0x8] sm:$0xff] %vm1645_vm14, %v1014_v24  ;;  %v707_v39 = vsel %vm547_vm12, %v1565_v9, %v966_v26  ;;  %v1677_v41 = vpop.f32.mrb[13].mxu1  ;;  %v590_v9 = vmin.f32 %v1659_v31, 0.0  ;;  %1148 = vpow2.f32 %v636_v45  ;;  %v592_v46 = vmin.f32 %v1662_v32, 0.0 }
 0x13b   : > { %v1137_v42 = vpop.eup %1136  ;;  %v1015_v43 = vpack.c.bf16 %v707_v39, %v706_v25  ;;  %v969_v44 = vadd.f32 -1.0, %v1135_v3  ;;  %v709_v8 = vsel %vm549_vm13, %v1571_v17, %v968_v40  ;;  %v591_v14 = vmin.f32 %v1681_v47, 0.0 }
 0x13c   : > { %v971_v48 = vadd.f32 -1.0, %v1137_v42  ;;  %v1688_v0 = vpop.f32.mrb[14].mxu0  ;;  %v1139_v54 = vpop.eup %1138  ;;  %v1016_v59 = vpack.c.bf16 %v709_v8, %v708_v38  ;;  %v638_v4 = vmul.f32 1.442695, %v590_v9  ;;  %v642_v53 = vmul.f32 1.442695, %v592_v46 }
 0x13d   : > { %835 = vst [vmem:[%s1632_s10 + $0x10] sm:$0xff] %v1015_v43  ;;  %v1693_v61 = vpop.f32.mrb[14].mxu1  ;;  %v1695_v62 = vpop.f32.mrb[15].mxu0  ;;  %v710_v63 = vsel %vm550_vm15, %v1574_v21, %v969_v44  ;;  %v970_v2 = vadd.f32 -1.0, %v1139_v54  ;;  %v1711_v21 = vadd.f32 %v1610_v58, %v1540_v52  ;;  %v1718_v18 = vadd.f32 %v1617_v5, %v1534_v49 }
 0x13e   : > { %v1141_v17 = vpop.eup %1140  ;;  %v712_v1 = vsel %vm552_vm0, %v1577_v22, %v971_v48  ;;  %v1703_v6 = vpop.f32.mrb[15].mxu1  ;;  %836 = vst.msk [vmem:[%s1632_s10 + $0x18] sm:$0xff] %vm1645_vm14, %v1016_v59  ;;  %1150 = vpow2.f32 %v638_v4  ;;  %vm554_vm3 = vcmp.gt.f32.partialorder %v1591_v35, 0.0  ;;  %v640_v57 = vmul.f32 1.442695, %v591_v14 }
 0x13f   : > { %v1143_v7 = vpop.eup %1142  ;;  %v972_v10 = vadd.f32 -1.0, %v1141_v17  ;;  %v711_v22 = vsel %vm551_vm1, %v1585_v30, %v970_v2  ;;  %1152 = vpow2.f32 %v642_v53  ;;  %v593_v25 = vmin.f32 %v1711_v21, 0.0 }
 0x140   : > { %v1145_v56 = vpop.eup %1144  ;;  %v973_v15 = vadd.f32 -1.0, %v1143_v7  ;;  %v1017_v19 = vpack.c.bf16 %v711_v22, %v710_v63  ;;  %v594_v26 = vmin.f32 %v1718_v18, 0.0  ;;  %1154 = vpow2.f32 %v640_v57 }
 0x141   : > { %v713_v20 = vsel %vm553_vm2, %v1588_v34, %v972_v10  ;;  %v975_v24 = vadd.f32 -1.0, %v1145_v56  ;;  %v1147_v5 = vpop.eup %1146  ;;  %v1733_v34 = vadd.f32 %v1625_v12, %v1536_v50  ;;  %v1737_v27 = vadd.f32 %v1627_v13, %v1538_v51 }
 0x142   : > { %v1018_v58 = vpack.c.bf16 %v713_v20, %v712_v1  ;;  %837 = vst [vmem:[%s1632_s10 + $0x20] sm:$0xff] %v1017_v19  ;;  %v714_v30 = vsel %vm554_vm3, %v1591_v35, %v973_v15  ;;  %v1741_v35 = vadd.f32 %v1638_v16, %v1540_v52  ;;  %v974_v60 = vadd.f32 -1.0, %v1147_v5 }
 0x143   : > { %v644_v29 = vmul.f32 1.442695, %v593_v25  ;;  %v646_v3 = vmul.f32 1.442695, %v594_v26  ;;  %v1745_v38 = vadd.f32 %v1653_v28, %v1534_v49  ;;  %vm556_vm4 = vcmp.gt.f32.partialorder %v1594_v36, 0.0 }
 0x144   : > { %838 = vst.msk [vmem:[%s1632_s10 + $0x28] sm:$0xff] %vm1645_vm14, %v1018_v58  ;;  %vm555_vm5 = vcmp.gt.f32.partialorder %v1608_v55, 0.0  ;;  %v596_v12 = vmin.f32 %v1733_v34, 0.0  ;;  %v595_v13 = vmin.f32 %v1737_v27, 0.0  ;;  %v1149_v39 = vpop.eup %1148  ;;  %v716_v16 = vsel %vm556_vm4, %v1594_v36, %v975_v24 }
 0x145   : > { %v715_v40 = vsel %vm555_vm5, %v1608_v55, %v974_v60  ;;  %1156 = vpow2.f32 %v644_v29  ;;  %v597_v42 = vmin.f32 %v1741_v35, 0.0  ;;  %v976_v28 = vadd.f32 -1.0, %v1149_v39 }
 0x146   : > { %v1019_v43 = vpack.c.bf16 %v715_v40, %v714_v30  ;;  %1158 = vpow2.f32 %v646_v3  ;;  %v650_v44 = vmul.f32 1.442695, %v596_v12  ;;  %vm557_vm8 = vcmp.gt.f32.partialorder %v1623_v11, 0.0 }
 0x147   : > { %v648_v45 = vmul.f32 1.442695, %v595_v13  ;;  %v652_v8 = vmul.f32 1.442695, %v597_v42  ;;  %v598_v48 = vmin.f32 %v1745_v38, 0.0  ;;  %v717_v36 = vsel %vm557_vm8, %v1623_v11, %v976_v28 }
 0x148   : > { %v1151_v9 = vpop.eup %1150  ;;  %839 = vst [vmem:[%s1632_s10 + $0x30] sm:$0xff] %v1019_v43  ;;  %1160 = vpow2.f32 %v650_v44  ;;  %v1760_v55 = vadd.f32 %v1664_v33, %v1536_v50  ;;  %v1764_v54 = vadd.f32 %v1666_v37, %v1538_v51  ;;  %v1020_v46 = vpack.c.bf16 %v717_v36, %v716_v16 }
 0x149   : > { %v1153_v59 = vpop.eup %1152  ;;  %v977_v17 = vadd.f32 -1.0, %v1151_v9  ;;  %1162 = vpow2.f32 %v648_v45  ;;  %v654_v63 = vmul.f32 1.442695, %v598_v48  ;;  %vm558_vm9 = vcmp.gt.f32.partialorder %v1659_v31, 0.0 }
 0x14a   : > { %1164 = vpow2.f32 %v652_v8  ;;  %v600_v1 = vmin.f32 %v1760_v55, 0.0  ;;  %840 = vst.msk [vmem:[%s1632_s10 + $0x38] sm:$0xff] %vm1645_vm14, %v1020_v46  ;;  %vm560_vm10 = vcmp.gt.f32.partialorder %v1662_v32, 0.0  ;;  %v979_v11 = vadd.f32 -1.0, %v1153_v59  ;;  %v1155_v37 = vpop.eup %1154 }
 0x14b   : > { %1166 = vpow2.f32 %v654_v63  ;;  %v599_v33 = vmin.f32 %v1764_v54, 0.0  ;;  %v718_v2 = vsel %vm558_vm9, %v1659_v31, %v977_v17  ;;  %v1776_v7 = vadd.f32 %v1677_v41, %v1540_v52 }
 0x14c   : > { %v658_v4 = vmul.f32 1.442695, %v600_v1  ;;  %v1780_v10 = vadd.f32 %v1688_v0, %v1534_v49  ;;  %v978_v53 = vadd.f32 -1.0, %v1155_v37  ;;  %v1784_v56 = vadd.f32 %v1693_v61, %v1536_v50 }
 0x14d   : > { %v656_v14 = vmul.f32 1.442695, %v599_v33  ;;  %v1788_v22 = vadd.f32 %v1695_v62, %v1538_v51  ;;  %vm559_vm11 = vcmp.gt.f32.partialorder %v1681_v47, 0.0  ;;  %vm561_vm12 = vcmp.gt.f32.partialorder %v1711_v21, 0.0 }
 0x14e   : > { %1168 = vpow2.f32 %v658_v4  ;;  %v601_v31 = vmin.f32 %v1776_v7, 0.0  ;;  %v720_v41 = vsel %vm560_vm10, %v1662_v32, %v979_v11  ;;  %v719_v50 = vsel %vm559_vm11, %v1681_v47, %v978_v53 }
 0x14f   : > { %v1157_v49 = vpop.eup %1156  ;;  %1170 = vpow2.f32 %v656_v14  ;;  %v602_v0 = vmin.f32 %v1780_v10, 0.0  ;;  %v1021_v61 = vpack.c.bf16 %v719_v50, %v718_v2  ;;  %v604_v19 = vmin.f32 %v1784_v56, 0.0 }
 0x150   : > { %v1159_v51 = vpop.eup %1158  ;;  %v980_v62 = vadd.f32 -1.0, %v1157_v49  ;;  %v660_v15 = vmul.f32 1.442695, %v601_v31  ;;  %vm562_vm13 = vcmp.gt.f32.partialorder %v1718_v18, 0.0  ;;  %v603_v57 = vmin.f32 %v1788_v22, 0.0  ;;  %v860_v49 = vld [vmem:[%s1632_s10 + $0x78] sm:$0xff] }
 0x151   : > { %v981_v20 = vadd.f32 -1.0, %v1159_v51  ;;  %v662_v58 = vmul.f32 1.442695, %v602_v0  ;;  %841 = vst [vmem:[%s1632_s10 + $0x40] sm:$0xff] %v1021_v61  ;;  %v666_v47 = vmul.f32 1.442695, %v604_v19  ;;  %v1807_v24 = vadd.f32 %v1703_v6, %v1540_v52 }
 0x152   : > { %v1161_v30 = vpop.eup %1160  ;;  %v721_v32 = vsel %vm561_vm12, %v1711_v21, %v980_v62  ;;  %1172 = vpow2.f32 %v660_v15  ;;  %vm564_vm15 = vcmp.gt.f32.partialorder %v1733_v34, 0.0  ;;  %v664_v21 = vmul.f32 1.442695, %v603_v57 }
 0x153   : > { %v1163_v25 = vpop.eup %1162  ;;  %v1022_v26 = vpack.c.bf16 %v721_v32, %v720_v41  ;;  %v983_v5 = vadd.f32 -1.0, %v1161_v30  ;;  %1174 = vpow2.f32 %v662_v58  ;;  %v722_v29 = vsel %vm562_vm13, %v1718_v18, %v981_v20 }
 0x154   : > { %v1165_v60 = vpop.eup %1164  ;;  %v982_v3 = vadd.f32 -1.0, %v1163_v25  ;;  %1176 = vpow2.f32 %v666_v47  ;;  %vm563_vm0 = vcmp.gt.f32.partialorder %v1737_v27, 0.0  ;;  %v605_v13 = vmin.f32 %v1807_v24, 0.0 }
 0x155   : > { %v1167_v12 = vpop.eup %1166  ;;  %842 = vst.msk [vmem:[%s1632_s10 + $0x48] sm:$0xff] %vm1645_vm14, %v1022_v26  ;;  %v724_v52 = vsel %vm564_vm15, %v1733_v34, %v983_v5  ;;  %v984_v6 = vadd.f32 -1.0, %v1165_v60  ;;  %vm565_vm1 = vcmp.gt.f32.partialorder %v1741_v35, 0.0  ;;  %1178 = vpow2.f32 %v664_v21 }
 0x156   : > { %v723_v39 = vsel %vm563_vm0, %v1737_v27, %v982_v3  ;;  %v985_v18 = vadd.f32 -1.0, %v1167_v12  ;;  %v668_v42 = vmul.f32 1.442695, %v605_v13  ;;  %vm566_vm2 = vcmp.gt.f32.partialorder %v1745_v38, 0.0 }
 0x157   : > { %v1023_v16 = vpack.c.bf16 %v723_v39, %v722_v29  ;;  %v725_v40 = vsel %vm565_vm1, %v1741_v35, %v984_v6  ;;  %vm567_vm3 = vcmp.gt.f32.partialorder %v1764_v54, 0.0  ;;  %vm848_vm4 = vsmask.f32 3328 }
 0x158   : > { %v1169_v43 = vpop.eup %1168  ;;  %v1024_v28 = vpack.c.bf16 %v725_v40, %v724_v52  ;;  %1180 = vpow2.f32 %v668_v42  ;;  %v726_v27 = vsel %vm566_vm2, %v1745_v38, %v985_v18  ;;  %vm568_vm5 = vcmp.gt.f32.partialorder %v1760_v55, 0.0  ;;  %vm1834_vm11 = vmand %vm831_vm6, %vm848_vm4 }
 0x159   : > { %v1171_v44 = vpop.eup %1170  ;;  %843 = vst [vmem:[%s1632_s10 + $0x50] sm:$0xff] %v1023_v16  ;;  %v987_v34 = vadd.f32 -1.0, %v1169_v43  ;;  %vm850_vm8 = vcmask 1047556   ;;  %vm851_vm9 = vsmask.f32 7424  ;;  %vm569_vm10 = vcmp.gt.f32.partialorder %v1776_v7, 0.0 }
 0x15a   : > { %844 = vst.msk [vmem:[%s1632_s10 + $0x58] sm:$0xff] %vm1645_vm14, %v1024_v28  ;;  %v986_v45 = vadd.f32 -1.0, %v1171_v44  ;;  %vm1841_vm12 = vmand %vm850_vm8, %vm851_vm9  ;;  %vm570_vm13 = vcmp.gt.f32.partialorder %v1780_v10, 0.0  ;;  %vm571_vm6 = vcmp.gt.f32.partialorder %v1788_v22, 0.0  ;;  %vm572_vm0 = vcmp.gt.f32.partialorder %v1784_v56, 0.0 }
 0x15b   : > { %v728_v9 = vsel %vm568_vm5, %v1760_v55, %v987_v34  ;;  %vm853_vm15 = vmor %vm1841_vm12, %vm1834_vm11 }
 0x15c   : > { %v1173_v35 = vpop.eup %1172  ;;  %v727_v8 = vsel %vm567_vm3, %v1764_v54, %v986_v45  ;;  %vm858_vm1 = vmand %vm832_vm7, %vm851_vm9 }
 0x15d   : > { %v1175_v48 = vpop.eup %1174  ;;  %v1025_v36 = vpack.c.bf16 %v727_v8, %v726_v27  ;;  %v988_v59 = vadd.f32 -1.0, %v1173_v35  ;;  %vm859_vm2 = vmor %vm858_vm1, %vm1834_vm11 }
 0x15e   : > { %v1177_v46 = vpop.eup %1176  ;;  %v989_v38 = vadd.f32 -1.0, %v1175_v48 }
 0x15f   : > { %845 = vst [vmem:[%s1632_s10 + $0x60] sm:$0xff] %v1025_v36  ;;  %v729_v54 = vsel %vm569_vm10, %v1776_v7, %v988_v59  ;;  %v1179_v55 = vpop.eup %1178  ;;  %v991_v11 = vadd.f32 -1.0, %v1177_v46  ;;  %v854_v7 = vld [vmem:[%s1632_s10 + $0x70] sm:$0xff] }
 0x160   : > { %v1026_v1 = vpack.c.bf16 %v729_v54, %v728_v9  ;;  %v730_v33 = vsel %vm570_vm13, %v1780_v10, %v989_v38  ;;  %v990_v37 = vadd.f32 -1.0, %v1179_v55 }
 0x161   : > { %v732_v23 = vsel %vm572_vm0, %v1784_v56, %v991_v11 }
 0x162   : > { %846 = vst.msk [vmem:[%s1632_s10 + $0x68] sm:$0xff] %vm1645_vm14, %v1026_v1  ;;  %v1181_v2 = vpop.eup %1180  ;;  %v731_v4 = vsel %vm571_vm6, %v1788_v22, %v990_v37  ;;  %vm573_vm14 = vcmp.gt.f32.partialorder %v1807_v24, 0.0 }
 0x163   : > { %v1027_v10 = vpack.c.bf16 %v731_v4, %v730_v33  ;;  %v992_v53 = vadd.f32 -1.0, %v1181_v2 }
 0x165   : > { %v855_v14 = vsel %vm853_vm15, %v1027_v10, %v854_v7  ;;  %v733_v31 = vsel %vm573_vm14, %v1807_v24, %v992_v53 }
 0x166   : > { %856 = vst [vmem:[%s1632_s10 + $0x70] sm:$0xff] %v855_v14  ;;  %v1028_v41 = vpack.c.bf16 %v733_v31, %v732_v23 }
 0x168   : > { %v861_v22 = vsel %vm859_vm2, %v1028_v41, %v860_v49 }
 0x169   : > { %862 = vst [vmem:[%s1632_s10 + $0x78] sm:$0xff] %v861_v22 }
 0x16a PF: > { %s14_s12 = sadd.s32 1, %s1220_s12  }
 0x16b   : > { %p11_p3 = scmp.ge.s32.totalorder %s14_s12, 4  }
 0x16d   :  { %13 = sbr.rel (!%p11_p3) target bundleno = 1 (0x1), region = 67 }
 0x174   :  { %884 = vsyncpa [#allocation3], 1 }
 0x175   :  { %886 = vsyncpa [#allocation3 + $0x1], 1 }

// kernel: patch_embedding_forward.3
= control target key start
LH: loop header
LB: loop body
LE: loop exit
PB: predicated region body
PF: predicated region fallthrough
CT: control target
= control target key end

     0   :  { %s3532_s18 = smov 0   ;;  %s3945_s0 = inlined_call_operand.vmem [shape: bf16[2,2520,11], index: 0, kind: input, shape index: {}]   ;;  %s3946_s1 = inlined_call_operand.vmem [shape: bf16[40,2520], index: 1, kind: input, shape index: {}]   ;;  %s3947_s2 = inlined_call_operand.vmem [shape: f32[40,1], index: 2, kind: input, shape index: {}]   ;;  %s3948_s3 = inlined_call_operand.vmem [shape: f32[40,40], index: 3, kind: input, shape index: {}]   ;;  %s3949_s4 = inlined_call_operand.vmem [shape: f32[40,1], index: 4, kind: input, shape index: {}]   ;;  %s3950_s5 = inlined_call_operand.vmem [shape: f32[2,40,11], index: 5, kind: output, shape index: {}]  }
   0x1 LB: > { %s2639_s19 = sadd.s32 4294967295, %s3496_s18   ;;  %p2643_p0 = scmp.ge.s32.totalorder %s3496_s18, 1  ;;  %s3496_s18 = sphi %s3532_s18, %s15_s18  }
   0x2   : > { %p187_p1 = scmp.lt.s32.totalorder %s3496_s18, 3 }
   0x4   : > { %p188_p2 = pnand %p2643_p0, %p187_p1 }
   0x5   : > { %p215_p3 = scmp.lt.s32.totalorder (!%p188_p2), %s2639_s19, 1  ;;  %v3276_v0 = vld [vmem:[%s3946_s1 + $0x4] ss:$80 sps:$4 sm:$0xff] (!%p188_p2)   ;;  %v3279_v1 = vld [vmem:[%s3946_s1 + $0xc] ss:$80 sps:$4 sm:$0xff] (!%p188_p2)   ;;  %v3498_v5 = vmov (!%p188_p2), 0  }
   0x6   : > { %191 = sbr.rel (%p188_p2) target bundleno = 684 (0x2ac), region = 40  ;;  %1879 = vmatprep.mubr.bf16.mxu0 (!%p188_p2), %v3276_v0  ;;  %1935 = vmatprep.mubr.bf16.mxu1 (!%p188_p2), %v3279_v1  ;;  %v3274_v33 = vld [vmem:[%s3946_s1] ss:$80 sps:$4 sm:$0xff] (!%p188_p2)   ;;  %v3277_v35 = vld [vmem:[%s3946_s1 + $0x8] ss:$80 sps:$4 sm:$0xff] (!%p188_p2)   ;;  %vm1833_vm0 = vcmask (!%p188_p2), 719872  }
   0x7   : > { %3240 = vset.pattern.permute.xlu0 (!%p188_p2), %v3498_v5  ;;  %3241 = vset.pattern.permute.xlu1 (!%p188_p2), %v3498_v5  ;;  %v3292_v37 = vld [vmem:[%s3946_s1 + $0xa4] ss:$80 sps:$4 sm:$0xff] (!%p188_p2)   ;;  %v3297_v39 = vld [vmem:[%s3946_s1 + $0xac] ss:$80 sps:$4 sm:$0xff] (!%p188_p2)   ;;  %v3294_v46 = vld [vmem:[%s3946_s1 + $0xa0] ss:$80 sps:$4 sm:$0xff] (!%p188_p2)  }
   0x8   : > { %v581_v44 = vld [vmem:[%s3946_s1 + $0x140] sm:$0xff] (!%p188_p2)  ;;  %v582_v47 = vld [vmem:[%s3946_s1 + $0x148] sm:$0xff] (!%p188_p2)  ;;  %vm1843_vm1 = vcmask (!%p188_p2), 1043456   ;;  %vm3500_vm2 = vmmov (!%p188_p2), 0   ;;  %vm2472_vm8 = vcmask (!%p188_p2), 326656   ;;  %vm2578_vm9 = vcmask (!%p188_p2), 89088  }
   0x9   : > { %v3301_v49 = vld [vmem:[%s3946_s1 + $0xa8] ss:$80 sps:$4 sm:$0xff] (!%p188_p2)   ;;  %v2687_v53 = vcombine.high (!%p188_p2), %v581_v44, %v581_v44  ;;  %v2689_v55 = vcombine.high (!%p188_p2), %v582_v47, %v582_v47  ;;  %v2686_v61 = vcombine.low (!%p188_p2), %v581_v44, %v581_v44  ;;  %v2688_v63 = vcombine.low (!%p188_p2), %v582_v47, %v582_v47 }
   0xd   : > { %s3952_s19 = smov (!%p215_p3, %s2639_s19), 1 }
   0xe   : > { %s3226_s24 = smul.u32 1260, %s3952_s19 }
   0xf   : > { %s3227_s20 = smul.u32 40, %s3952_s19 }
  0x10   : > { %s3552_s27 = scalar_lea.vmem %s3945_s0, %s3226_s24 }
  0x11   : > { %v3242_v2 = vld [vmem:[%s3552_s27 + $0x40] sm:$0xff]   ;;  %v3246_v7 = vld [vmem:[%s3552_s27 + $0x48] sm:$0xff]   ;;  %v3250_v11 = vld [vmem:[%s3552_s27 + $0x50] sm:$0xff]   ;;  %s224_s23 = scalar_lea.vmem %s3950_s5, %s3227_s20 }
  0x12   : > { %v3243_v3 = vld [vmem:[%s3552_s27 + $0xc0] sm:$0xff]   ;;  %2879 = vmatprep.subr.bf16.mxu0 %v3242_v2  ;;  %v3247_v8 = vld [vmem:[%s3552_s27 + $0xc8] sm:$0xff]   ;;  %v3251_v12 = vld [vmem:[%s3552_s27 + $0xd0] sm:$0xff]  }
  0x13   : > { %v3244_v4 = vld [vmem:[%s3552_s27] sm:$0xff]   ;;  %2913 = vmatprep.subr.bf16.mxu1 %v3243_v3  ;;  %v3248_v9 = vld [vmem:[%s3552_s27 + $0x8] sm:$0xff]   ;;  %v3252_v13 = vld [vmem:[%s3552_s27 + $0x10] sm:$0xff]  }
  0x14   : > { %v3245_v6 = vld [vmem:[%s3552_s27 + $0x80] sm:$0xff]   ;;  %2880 = vmatpush3.bf16.msra.mxu0 %v3244_v4  ;;  %v3249_v10 = vld [vmem:[%s3552_s27 + $0x88] sm:$0xff]   ;;  %v3253_v14 = vld [vmem:[%s3552_s27 + $0x90] sm:$0xff]  }
  0x15   : > { %2914 = vmatpush3.bf16.msra.mxu1 %v3245_v6  ;;  %2881 = vmatprep.subr.bf16.mxu0 %v3246_v7  ;;  %v3254_v15 = vld [vmem:[%s3552_s27 + $0x58] sm:$0xff]   ;;  %v3258_v19 = vld [vmem:[%s3552_s27 + $0x60] sm:$0xff]   ;;  %v3262_v23 = vld [vmem:[%s3552_s27 + $0x68] sm:$0xff]  }
  0x16   : > { %2915 = vmatprep.subr.bf16.mxu1 %v3247_v8  ;;  %v3255_v16 = vld [vmem:[%s3552_s27 + $0xd8] sm:$0xff]   ;;  %v3259_v20 = vld [vmem:[%s3552_s27 + $0xe0] sm:$0xff]   ;;  %v3263_v24 = vld [vmem:[%s3552_s27 + $0xe8] sm:$0xff]  }
  0x17   : > { %v3256_v17 = vld [vmem:[%s3552_s27 + $0x18] sm:$0xff]   ;;  %v3260_v21 = vld [vmem:[%s3552_s27 + $0x20] sm:$0xff]   ;;  %v3264_v25 = vld [vmem:[%s3552_s27 + $0x28] sm:$0xff]  }
  0x18   : > { %2882 = vmatpush3.bf16.msra.mxu0 %v3248_v9  ;;  %v3257_v18 = vld [vmem:[%s3552_s27 + $0x98] sm:$0xff]   ;;  %v3261_v22 = vld [vmem:[%s3552_s27 + $0xa0] sm:$0xff]   ;;  %v3265_v26 = vld [vmem:[%s3552_s27 + $0xa8] sm:$0xff]  }
  0x19   : > { %2916 = vmatpush3.bf16.msra.mxu1 %v3249_v10  ;;  %2883 = vmatprep.subr.bf16.mxu0 %v3250_v11  ;;  %v3266_v27 = vld [vmem:[%s3552_s27 + $0x70] sm:$0xff]   ;;  %v3270_v31 = vld [vmem:[%s3552_s27 + $0x78] sm:$0xff]   ;;  %v3280_v38 = vld [vmem:[%s3552_s27 + $0x140] sm:$0xff]  }
  0x1a   : > { %2917 = vmatprep.subr.bf16.mxu1 %v3251_v12  ;;  %v3267_v28 = vld [vmem:[%s3552_s27 + $0xf0] sm:$0xff]   ;;  %v3271_v32 = vld [vmem:[%s3552_s27 + $0xf8] sm:$0xff]   ;;  %v3281_v40 = vld [vmem:[%s3552_s27 + $0x1c0] sm:$0xff]  }
  0x1b   : > { %v3268_v29 = vld [vmem:[%s3552_s27 + $0x30] sm:$0xff]   ;;  %v3272_v34 = vld [vmem:[%s3552_s27 + $0x38] sm:$0xff]   ;;  %v3282_v41 = vld [vmem:[%s3552_s27 + $0x100] sm:$0xff]  }
  0x1c   : > { %2884 = vmatpush3.bf16.msra.mxu0 %v3252_v13  ;;  %v3269_v30 = vld [vmem:[%s3552_s27 + $0xb0] sm:$0xff]   ;;  %v3273_v36 = vld [vmem:[%s3552_s27 + $0xb8] sm:$0xff]   ;;  %v3283_v42 = vld [vmem:[%s3552_s27 + $0x180] sm:$0xff]  }
  0x1d   : > { %2918 = vmatpush3.bf16.msra.mxu1 %v3253_v14  ;;  %2885 = vmatprep.subr.bf16.mxu0 %v3254_v15  ;;  %v3284_v43 = vld [vmem:[%s3552_s27 + $0x148] sm:$0xff]   ;;  %v3288_v51 = vld [vmem:[%s3552_s27 + $0x150] sm:$0xff]   ;;  %v3295_v57 = vld [vmem:[%s3552_s27 + $0x158] sm:$0xff]  }
  0x1e   : > { %2919 = vmatprep.subr.bf16.mxu1 %v3255_v16  ;;  %v3285_v45 = vld [vmem:[%s3552_s27 + $0x1c8] sm:$0xff]   ;;  %v3289_v52 = vld [vmem:[%s3552_s27 + $0x1d0] sm:$0xff]   ;;  %v3296_v58 = vld [vmem:[%s3552_s27 + $0x1d8] sm:$0xff]  }
  0x1f   : > { %v3286_v48 = vld [vmem:[%s3552_s27 + $0x108] sm:$0xff]   ;;  %v3290_v54 = vld [vmem:[%s3552_s27 + $0x110] sm:$0xff]   ;;  %v3299_v59 = vld [vmem:[%s3552_s27 + $0x118] sm:$0xff]  }
  0x20   : > { %2886 = vmatpush3.bf16.msra.mxu0 %v3256_v17  ;;  %v3287_v50 = vld [vmem:[%s3552_s27 + $0x188] sm:$0xff]   ;;  %v3291_v56 = vld [vmem:[%s3552_s27 + $0x190] sm:$0xff]   ;;  %v3300_v60 = vld [vmem:[%s3552_s27 + $0x198] sm:$0xff]  }
  0x21   : > { %2920 = vmatpush3.bf16.msra.mxu1 %v3257_v18  ;;  %2887 = vmatprep.subr.bf16.mxu0 %v3258_v19  ;;  %v3302_v62 = vld [vmem:[%s3552_s27 + $0x160] sm:$0xff]   ;;  %v3306_v3 = vld [vmem:[%s3552_s27 + $0x168] sm:$0xff]   ;;  %v3314_v8 = vld [vmem:[%s3552_s27 + $0x170] sm:$0xff]  }
  0x22   : > { %2921 = vmatprep.subr.bf16.mxu1 %v3259_v20  ;;  %v3303_v0 = vld [vmem:[%s3552_s27 + $0x1e0] sm:$0xff]   ;;  %v3307_v4 = vld [vmem:[%s3552_s27 + $0x1e8] sm:$0xff]   ;;  %v3315_v9 = vld [vmem:[%s3552_s27 + $0x1f0] sm:$0xff]  }
  0x23   : > { %v3304_v1 = vld [vmem:[%s3552_s27 + $0x120] sm:$0xff]   ;;  %v3310_v6 = vld [vmem:[%s3552_s27 + $0x128] sm:$0xff]   ;;  %v3316_v10 = vld [vmem:[%s3552_s27 + $0x130] sm:$0xff]  }
  0x24   : > { %2888 = vmatpush3.bf16.msra.mxu0 %v3260_v21  ;;  %v3305_v2 = vld [vmem:[%s3552_s27 + $0x1a0] sm:$0xff]   ;;  %v3311_v7 = vld [vmem:[%s3552_s27 + $0x1a8] sm:$0xff]   ;;  %v3317_v11 = vld [vmem:[%s3552_s27 + $0x1b0] sm:$0xff]  }
  0x25   : > { %2922 = vmatpush3.bf16.msra.mxu1 %v3261_v22  ;;  %2889 = vmatprep.subr.bf16.mxu0 %v3262_v23  ;;  %v3318_v12 = vld [vmem:[%s3552_s27 + $0x178] sm:$0xff]   ;;  %v3322_v14 = vld [vmem:[%s3946_s1 + $0x10] ss:$80 sps:$4 sm:$0xff]   ;;  %v3324_v17 = vld [vmem:[%s3946_s1 + $0x14] ss:$80 sps:$4 sm:$0xff]  }
  0x26   : > { %2923 = vmatprep.subr.bf16.mxu1 %v3263_v24  ;;  %v3319_v13 = vld [vmem:[%s3552_s27 + $0x1f8] sm:$0xff]   ;;  %v3328_v20 = vld [vmem:[%s3552_s27 + $0x240] sm:$0xff]   ;;  %v3332_v24 = vld [vmem:[%s3552_s27 + $0x248] sm:$0xff]  }
  0x27   : > { %v3320_v15 = vld [vmem:[%s3552_s27 + $0x138] sm:$0xff]   ;;  %v3329_v21 = vld [vmem:[%s3552_s27 + $0x2c0] sm:$0xff]  }
  0x28   : > { %2890 = vmatpush3.bf16.msra.mxu0 %v3264_v25  ;;  %v3321_v16 = vld [vmem:[%s3552_s27 + $0x1b8] sm:$0xff]   ;;  %v3330_v22 = vld [vmem:[%s3552_s27 + $0x200] sm:$0xff]   ;;  %v3333_v25 = vld [vmem:[%s3552_s27 + $0x2c8] sm:$0xff]  }
  0x29   : > { %2924 = vmatpush3.bf16.msra.mxu1 %v3265_v26  ;;  %2891 = vmatprep.subr.bf16.mxu0 %v3266_v27  ;;  %v3325_v18 = vld [vmem:[%s3946_s1 + $0x18] ss:$80 sps:$4 sm:$0xff]   ;;  %v3327_v19 = vld [vmem:[%s3946_s1 + $0x1c] ss:$80 sps:$4 sm:$0xff]   ;;  %v3331_v23 = vld [vmem:[%s3552_s27 + $0x280] sm:$0xff]  }
  0x2a   : > { %2925 = vmatprep.subr.bf16.mxu1 %v3267_v28  ;;  %v3334_v26 = vld [vmem:[%s3552_s27 + $0x208] sm:$0xff]   ;;  %v3336_v28 = vld [vmem:[%s3946_s1 + $0xb4] ss:$80 sps:$4 sm:$0xff]  }
  0x2b   : > { %v3335_v27 = vld [vmem:[%s3552_s27 + $0x288] sm:$0xff]   ;;  %v3353_v44 = vld [vmem:[%s3552_s27 + $0x2e0] sm:$0xff]  }
  0x2c   : > { %2892 = vmatpush3.bf16.msra.mxu0 %v3268_v29  ;;  %v3338_v29 = vld [vmem:[%s3946_s1 + $0xb0] ss:$80 sps:$4 sm:$0xff]  }
  0x2d   : > { %2926 = vmatpush3.bf16.msra.mxu1 %v3269_v30  ;;  %2893 = vmatprep.subr.bf16.mxu0 %v3270_v31  ;;  %v3339_v30 = vld [vmem:[%s3552_s27 + $0x250] sm:$0xff]   ;;  %v3355_v47 = vld [vmem:[%s3552_s27 + $0x220] sm:$0xff]  }
  0x2e   : > { %2927 = vmatprep.subr.bf16.mxu1 %v3271_v32  ;;  %v3340_v31 = vld [vmem:[%s3552_s27 + $0x2d0] sm:$0xff]   ;;  %v3341_v32 = vld [vmem:[%s3946_s1 + $0xbc] ss:$80 sps:$4 sm:$0xff]  }
  0x30   : > { %2894 = vmatpush3.bf16.msra.mxu0 %v3272_v34  ;;  %v3344_v34 = vld [vmem:[%s3552_s27 + $0x290] sm:$0xff]  }
  0x31   : > { %2928 = vmatpush3.bf16.msra.mxu1 %v3273_v36  ;;  %2947 = vmatprep.subr.bf16.mxu0 %v3280_v38  ;;  %v3346_v36 = vld [vmem:[%s3552_s27 + $0x258] sm:$0xff]  }
  0x32   : > { %2981 = vmatprep.subr.bf16.mxu1 %v3281_v40  ;;  %v3348_v38 = vld [vmem:[%s3552_s27 + $0x218] sm:$0xff]   ;;  %v583_v40 = vld [vmem:[%s3946_s1 + $0x150] sm:$0xff] }
  0x33   : > { %1880 = vmatmul.mubr.bf16.vlgmr.msra.gmra.mrb[0].mxu0 %v3274_v33  ;;  %v3343_v33 = vld [vmem:[%s3552_s27 + $0x210] sm:$0xff]  }
  0x34   : > { %1936 = vmatmul.mubr.bf16.vlgmr.msra.gmra.mrb[0].mxu1 %v3277_v35  ;;  %2948 = vmatpush3.bf16.msra.mxu0 %v3282_v41  ;;  %v3345_v35 = vld [vmem:[%s3946_s1 + $0xb8] ss:$80 sps:$4 sm:$0xff]   ;;  %v2691_v41 = vcombine.high %v583_v40, %v583_v40 }
  0x35   : > { %2982 = vmatpush3.bf16.msra.mxu1 %v3283_v42  ;;  %1887 = vmatprep.mubr.bf16.mxu0 %v3292_v37  ;;  %v3347_v37 = vld [vmem:[%s3552_s27 + $0x2d8] sm:$0xff]   ;;  %v2690_v42 = vcombine.low %v583_v40, %v583_v40  ;;  %v592_v40 = vld [vmem:[%s3947_s2 + $0x8] sm:$0xff] }
  0x36   : > { %2949 = vmatprep.subr.bf16.mxu0 %v3284_v43  ;;  %1943 = vmatprep.mubr.bf16.mxu1 %v3297_v39  ;;  %v3349_v39 = vld [vmem:[%s3552_s27 + $0x298] sm:$0xff]   ;;  %v3352_v43 = vld [vmem:[%s3552_s27 + $0x260] sm:$0xff]  }
  0x37   : > { %2983 = vmatprep.subr.bf16.mxu1 %v3285_v45  ;;  %v584_v45 = vld [vmem:[%s3946_s1 + $0x158] sm:$0xff] }
  0x38   : > { %2950 = vmatpush3.bf16.msra.mxu0 %v3286_v48  ;;  %v2692_v48 = vcombine.low %v584_v45, %v584_v45 }
  0x39   : > { %2984 = vmatpush3.bf16.msra.mxu1 %v3287_v50  ;;  %2951 = vmatprep.subr.bf16.mxu0 %v3288_v51  ;;  %v3358_v50 = vld [vmem:[%s3552_s27 + $0x268] sm:$0xff]  }
  0x3a   : > { %2985 = vmatprep.subr.bf16.mxu1 %v3289_v52  ;;  %v3359_v51 = vld [vmem:[%s3552_s27 + $0x2e8] sm:$0xff]  }
  0x3b   : > { %1888 = vmatmul.mubr.bf16.gmra.mrb[4].mxu0 %v3294_v46  ;;  %v2693_v46 = vcombine.high %v584_v45, %v584_v45  ;;  %v3360_v52 = vld [vmem:[%s3552_s27 + $0x228] sm:$0xff]   ;;  %v3416_v45 = vld [vmem:[%s3552_s27 + $0x338] sm:$0xff]  }
  0x3c   : > { %2952 = vmatpush3.bf16.msra.mxu0 %v3290_v54  ;;  %1944 = vmatmul.mubr.bf16.gmra.mrb[4].mxu1 %v3301_v49  ;;  %v3356_v49 = vld [vmem:[%s3552_s27 + $0x2a0] sm:$0xff]   ;;  %v3362_v54 = vld [vmem:[%s3552_s27 + $0x270] sm:$0xff]  }
  0x3d   : > { %2986 = vmatpush3.bf16.msra.mxu1 %v3291_v56  ;;  %1895 = vmatprep.mubr.bf16.mxu0 %v2687_v53  ;;  %v3361_v53 = vld [vmem:[%s3552_s27 + $0x2a8] sm:$0xff]   ;;  %v3364_v56 = vld [vmem:[%s3552_s27 + $0x230] sm:$0xff]  }
  0x3e   : > { %2953 = vmatprep.subr.bf16.mxu0 %v3295_v57  ;;  %1951 = vmatprep.mubr.bf16.mxu1 %v2689_v55  ;;  %v3363_v55 = vld [vmem:[%s3552_s27 + $0x2f0] sm:$0xff]  }
  0x3f   : > { %2987 = vmatprep.subr.bf16.mxu1 %v3296_v58  ;;  %v3365_v57 = vld [vmem:[%s3552_s27 + $0x2b0] sm:$0xff]   ;;  %v3366_v58 = vld [vmem:[%s3552_s27 + $0x278] sm:$0xff]  }
  0x40   : > { %2954 = vmatpush3.bf16.msra.mxu0 %v3299_v59  ;;  %v3367_v59 = vld [vmem:[%s3552_s27 + $0x2f8] sm:$0xff]  }
  0x41   : > { %2988 = vmatpush3.bf16.msra.mxu1 %v3300_v60  ;;  %2955 = vmatprep.subr.bf16.mxu0 %v3302_v62  ;;  %v3368_v60 = vld [vmem:[%s3552_s27 + $0x238] sm:$0xff]   ;;  %v3370_v62 = vld [vmem:[%s3946_s1 + $0x20] ss:$80 sps:$4 sm:$0xff]  }
  0x42   : > { %2989 = vmatprep.subr.bf16.mxu1 %v3303_v0  ;;  %v3373_v0 = vld [vmem:[%s3946_s1 + $0x28] ss:$80 sps:$4 sm:$0xff]  }
  0x43   : > { %1896 = vmatmul.mubr.bf16.gmra.mrb[8].mxu0 %v2686_v61  ;;  %v3369_v61 = vld [vmem:[%s3552_s27 + $0x2b8] sm:$0xff]  }
  0x44   : > { %2956 = vmatpush3.bf16.msra.mxu0 %v3304_v1  ;;  %1952 = vmatmul.mubr.bf16.gmra.mrb[8].mxu1 %v2688_v63  ;;  %v3372_v63 = vld [vmem:[%s3946_s1 + $0x24] ss:$80 sps:$4 sm:$0xff]   ;;  %v3375_v1 = vld [vmem:[%s3946_s1 + $0x2c] ss:$80 sps:$4 sm:$0xff]  }
  0x45   : > { %2990 = vmatpush3.bf16.msra.mxu1 %v3305_v2  ;;  %2957 = vmatprep.subr.bf16.mxu0 %v3306_v3  ;;  %v3376_v2 = vld [vmem:[%s3552_s27 + $0x340] sm:$0xff]  }
  0x46   : > { %2991 = vmatprep.subr.bf16.mxu1 %v3307_v4  ;;  %1991 = vmatprep.mubr.bf16.mxu0 %v3324_v17  ;;  %v3377_v3 = vld [vmem:[%s3552_s27 + $0x3c0] sm:$0xff]   ;;  %v3392_v17 = vld [vmem:[%s3552_s27 + $0x390] sm:$0xff]  }
  0x47   : > { %2047 = vmatprep.mubr.bf16.mxu1 %v3327_v19  ;;  %v3378_v4 = vld [vmem:[%s3552_s27 + $0x300] sm:$0xff]   ;;  %v3394_v19 = vld [vmem:[%s3552_s27 + $0x358] sm:$0xff]  }
  0x48   : > { %2958 = vmatpush3.bf16.msra.mxu0 %v3310_v6  ;;  %v3379_v6 = vld [vmem:[%s3552_s27 + $0x380] sm:$0xff]  }
  0x49   : > { %2992 = vmatpush3.bf16.msra.mxu1 %v3311_v7  ;;  %2959 = vmatprep.subr.bf16.mxu0 %v3314_v8  ;;  %v3380_v7 = vld [vmem:[%s3552_s27 + $0x348] sm:$0xff]  }
  0x4a   : > { %2993 = vmatprep.subr.bf16.mxu1 %v3315_v9  ;;  %v3381_v8 = vld [vmem:[%s3552_s27 + $0x3c8] sm:$0xff]  }
  0x4b   : > { %v3382_v9 = vld [vmem:[%s3552_s27 + $0x308] sm:$0xff]  }
  0x4c   : > { %2960 = vmatpush3.bf16.msra.mxu0 %v3316_v10  ;;  %v3383_v10 = vld [vmem:[%s3552_s27 + $0x388] sm:$0xff]  }
  0x4d   : > { %2994 = vmatpush3.bf16.msra.mxu1 %v3317_v11  ;;  %2961 = vmatprep.subr.bf16.mxu0 %v3318_v12  ;;  %v3384_v11 = vld [vmem:[%s3946_s1 + $0xc4] ss:$80 sps:$4 sm:$0xff]   ;;  %v3386_v12 = vld [vmem:[%s3946_s1 + $0xc0] ss:$80 sps:$4 sm:$0xff]  }
  0x4e   : > { %2995 = vmatprep.subr.bf16.mxu1 %v3319_v13  ;;  %v3387_v13 = vld [vmem:[%s3552_s27 + $0x350] sm:$0xff]  }
  0x50   : > { %2962 = vmatpush3.bf16.msra.mxu0 %v3320_v15  ;;  %v3389_v15 = vld [vmem:[%s3946_s1 + $0xcc] ss:$80 sps:$4 sm:$0xff]  }
  0x51   : > { %2996 = vmatpush3.bf16.msra.mxu1 %v3321_v16  ;;  %3015 = vmatprep.subr.bf16.mxu0 %v3328_v20  ;;  %v3391_v16 = vld [vmem:[%s3552_s27 + $0x310] sm:$0xff]   ;;  %v3395_v20 = vld [vmem:[%s3552_s27 + $0x3d8] sm:$0xff]  }
  0x52   : > { %3049 = vmatprep.subr.bf16.mxu1 %v3329_v21  ;;  %v3396_v21 = vld [vmem:[%s3552_s27 + $0x318] sm:$0xff]  }
  0x53   : > { %1992 = vmatmul.mubr.bf16.vlgmr.msra.gmra.mrb[12].mxu0 %v3322_v14  ;;  %v3388_v14 = vld [vmem:[%s3552_s27 + $0x3d0] sm:$0xff]  }
  0x54   : > { %2048 = vmatmul.mubr.bf16.vlgmr.msra.gmra.mrb[12].mxu1 %v3325_v18  ;;  %3016 = vmatpush3.bf16.msra.mxu0 %v3330_v22  ;;  %v3393_v18 = vld [vmem:[%s3946_s1 + $0xc8] ss:$80 sps:$4 sm:$0xff]  }
  0x55   : > { %3050 = vmatpush3.bf16.msra.mxu1 %v3331_v23  ;;  %3017 = vmatprep.subr.bf16.mxu0 %v3332_v24  ;;  %v3397_v22 = vld [vmem:[%s3552_s27 + $0x398] sm:$0xff]   ;;  %v585_v23 = vld [vmem:[%s3946_s1 + $0x160] sm:$0xff] }
  0x56   : > { %3051 = vmatprep.subr.bf16.mxu1 %v3333_v25  ;;  %1999 = vmatprep.mubr.bf16.mxu0 %v3336_v28  ;;  %v2695_v24 = vcombine.high %v585_v23, %v585_v23  ;;  %v2694_v25 = vcombine.low %v585_v23, %v585_v23  ;;  %v586_v28 = vld [vmem:[%s3946_s1 + $0x168] sm:$0xff]  ;;  %v3456_v23 = vld [vmem:[%s3552_s27 + $0x438] sm:$0xff]  }
  0x57   : > { %2055 = vmatprep.mubr.bf16.mxu1 %v3341_v32  ;;  %v3404_v32 = vld [vmem:[%s3552_s27 + $0x3a0] sm:$0xff]  }
  0x58   : > { %3018 = vmatpush3.bf16.msra.mxu0 %v3334_v26  ;;  %v3400_v26 = vld [vmem:[%s3552_s27 + $0x360] sm:$0xff]  }
  0x59   : > { %3052 = vmatpush3.bf16.msra.mxu1 %v3335_v27  ;;  %3019 = vmatprep.subr.bf16.mxu0 %v3339_v30  ;;  %v3401_v27 = vld [vmem:[%s3552_s27 + $0x3e0] sm:$0xff]  }
  0x5a   : > { %3053 = vmatprep.subr.bf16.mxu1 %v3340_v31  ;;  %v3403_v30 = vld [vmem:[%s3552_s27 + $0x320] sm:$0xff]   ;;  %v2696_v31 = vcombine.low %v586_v28, %v586_v28 }
  0x5b   : > { %2000 = vmatmul.mubr.bf16.gmra.mrb[16].mxu0 %v3338_v29  ;;  %v2697_v29 = vcombine.high %v586_v28, %v586_v28  ;;  %v3461_v28 = vld [vmem:[%s3552_s27 + $0x4c0] sm:$0xff]  }
  0x5c   : > { %3020 = vmatpush3.bf16.msra.mxu0 %v3343_v33  ;;  %2056 = vmatmul.mubr.bf16.gmra.mrb[16].mxu1 %v3345_v35  ;;  %v3406_v33 = vld [vmem:[%s3552_s27 + $0x368] sm:$0xff]   ;;  %v591_v35 = vld [vmem:[%s3947_s2] sm:$0xff] }
  0x5d   : > { %3054 = vmatpush3.bf16.msra.mxu1 %v3344_v34  ;;  %3021 = vmatprep.subr.bf16.mxu0 %v3346_v36  ;;  %v3407_v34 = vld [vmem:[%s3552_s27 + $0x3e8] sm:$0xff]  }
  0x5e   : > { %3055 = vmatprep.subr.bf16.mxu1 %v3347_v37  ;;  %2007 = vmatprep.mubr.bf16.mxu0 %v2691_v41  ;;  %v3408_v36 = vld [vmem:[%s3552_s27 + $0x328] sm:$0xff]   ;;  %v3412_v41 = vld [vmem:[%s3552_s27 + $0x330] sm:$0xff]  }
  0x5f   : > { %2063 = vmatprep.mubr.bf16.mxu1 %v2693_v46  ;;  %598 = vperm.xlu0 %3240, %v591_v35   ;;  %v3409_v37 = vld [vmem:[%s3552_s27 + $0x3a8] sm:$0xff]   ;;  %v3417_v46 = vld [vmem:[%s3552_s27 + $0x3b8] sm:$0xff]  }
  0x60   : > { %3022 = vmatpush3.bf16.msra.mxu0 %v3348_v38  ;;  %v3410_v38 = vld [vmem:[%s3552_s27 + $0x370] sm:$0xff]  }
  0x61   : > { %3056 = vmatpush3.bf16.msra.mxu1 %v3349_v39  ;;  %3023 = vmatprep.subr.bf16.mxu0 %v3352_v43  ;;  %v3411_v39 = vld [vmem:[%s3552_s27 + $0x3f0] sm:$0xff]   ;;  %v3414_v43 = vld [vmem:[%s3552_s27 + $0x378] sm:$0xff]  }
  0x62   : > { %3057 = vmatprep.subr.bf16.mxu1 %v3353_v44  ;;  %v3415_v44 = vld [vmem:[%s3552_s27 + $0x3f8] sm:$0xff]  }
  0x63   : > { %2008 = vmatmul.mubr.bf16.gmra.mrb[20].mxu0 %v2690_v42  ;;  %603 = vperm.xlu0 %3240, %v592_v40   ;;  %v3413_v42 = vld [vmem:[%s3552_s27 + $0x3b0] sm:$0xff]   ;;  %v2446_v40 = vld [vmem:[%s3949_s4 + $0x20] sm:$0xff] }
  0x64   : > { %3024 = vmatpush3.bf16.msra.mxu0 %v3355_v47  ;;  %2064 = vmatmul.mubr.bf16.gmra.mrb[20].mxu1 %v2692_v48  ;;  %v3418_v47 = vld [vmem:[%s3946_s1 + $0x30] ss:$80 sps:$4 sm:$0xff]   ;;  %v3420_v48 = vld [vmem:[%s3946_s1 + $0x34] ss:$80 sps:$4 sm:$0xff]  }
  0x65   : > { %3058 = vmatpush3.bf16.msra.mxu1 %v3356_v49  ;;  %3025 = vmatprep.subr.bf16.mxu0 %v3358_v50  ;;  %v3421_v49 = vld [vmem:[%s3946_s1 + $0x38] ss:$80 sps:$4 sm:$0xff]   ;;  %v3423_v50 = vld [vmem:[%s3946_s1 + $0x3c] ss:$80 sps:$4 sm:$0xff]  }
  0x66   : > { %3059 = vmatprep.subr.bf16.mxu1 %v3359_v51  ;;  %2103 = vmatprep.mubr.bf16.mxu0 %v3372_v63  ;;  %v3424_v51 = vld [vmem:[%s3552_s27 + $0x440] sm:$0xff]   ;;  %v3436_v63 = vld [vmem:[%s3552_s27 + $0x410] sm:$0xff]  }
  0x67   : > { %2159 = vmatprep.mubr.bf16.mxu1 %v3375_v1  ;;  %v3438_v1 = vld [vmem:[%s3946_s1 + $0xd8] ss:$80 sps:$4 sm:$0xff]  }
  0x68   : > { %3026 = vmatpush3.bf16.msra.mxu0 %v3360_v52  ;;  %v593_v52 = vld [vmem:[%s3947_s2 + $0x10] sm:$0xff] }
  0x69   : > { %3060 = vmatpush3.bf16.msra.mxu1 %v3361_v53  ;;  %3027 = vmatprep.subr.bf16.mxu0 %v3362_v54  ;;  %v3425_v53 = vld [vmem:[%s3552_s27 + $0x400] sm:$0xff]  }
  0x6a   : > { %3061 = vmatprep.subr.bf16.mxu1 %v3363_v55  ;;  %608 = vperm.xlu1 %3241, %v593_v52   ;;  %v3426_v54 = vld [vmem:[%s3552_s27 + $0x480] sm:$0xff]   ;;  %v3427_v55 = vld [vmem:[%s3552_s27 + $0x448] sm:$0xff]  }
  0x6c   : > { %3028 = vmatpush3.bf16.msra.mxu0 %v3364_v56  ;;  %v594_v56 = vld [vmem:[%s3947_s2 + $0x18] sm:$0xff] }
  0x6d   : > { %3062 = vmatpush3.bf16.msra.mxu1 %v3365_v57  ;;  %3029 = vmatprep.subr.bf16.mxu0 %v3366_v58  ;;  %v3428_v57 = vld [vmem:[%s3552_s27 + $0x408] sm:$0xff]  }
  0x6e   : > { %3063 = vmatprep.subr.bf16.mxu1 %v3367_v59  ;;  %v3429_v58 = vld [vmem:[%s3552_s27 + $0x488] sm:$0xff]   ;;  %613 = vperm.xlu1 %3241, %v594_v56   ;;  %v3430_v59 = vld [vmem:[%s3946_s1 + $0xd4] ss:$80 sps:$4 sm:$0xff]  }
  0x70   : > { %3030 = vmatpush3.bf16.msra.mxu0 %v3368_v60  ;;  %v3432_v60 = vld [vmem:[%s3946_s1 + $0xd0] ss:$80 sps:$4 sm:$0xff]  }
  0x71   : > { %3064 = vmatpush3.bf16.msra.mxu1 %v3369_v61  ;;  %3083 = vmatprep.subr.bf16.mxu0 %v3376_v2  ;;  %v3433_v61 = vld [vmem:[%s3552_s27 + $0x450] sm:$0xff]   ;;  %v3439_v2 = vld [vmem:[%s3552_s27 + $0x458] sm:$0xff]  }
  0x72   : > { %3117 = vmatprep.subr.bf16.mxu1 %v3377_v3  ;;  %v595_v3 = vld [vmem:[%s3947_s2 + $0x20] sm:$0xff] }
  0x73   : > { %2104 = vmatmul.mubr.bf16.vlgmr.msra.gmra.mrb[24].mxu0 %v3370_v62  ;;  %v3434_v62 = vld [vmem:[%s3946_s1 + $0xdc] ss:$80 sps:$4 sm:$0xff]   ;;  %618 = vperm.xlu0 %3240, %v595_v3  }
  0x74   : > { %2160 = vmatmul.mubr.bf16.vlgmr.msra.gmra.mrb[24].mxu1 %v3373_v0  ;;  %3084 = vmatpush3.bf16.msra.mxu0 %v3378_v4  ;;  %v3437_v0 = vld [vmem:[%s3552_s27 + $0x490] sm:$0xff]   ;;  %v3440_v4 = vld [vmem:[%s3552_s27 + $0x418] sm:$0xff]  }
  0x75   : > { %3118 = vmatpush3.bf16.msra.mxu1 %v3379_v6  ;;  %3085 = vmatprep.subr.bf16.mxu0 %v3380_v7  ;;  %v3441_v6 = vld [vmem:[%s3552_s27 + $0x498] sm:$0xff]   ;;  %v587_v7 = vld [vmem:[%s3946_s1 + $0x170] sm:$0xff] }
  0x76   : > { %3119 = vmatprep.subr.bf16.mxu1 %v3381_v8  ;;  %2111 = vmatprep.mubr.bf16.mxu0 %v3384_v11  ;;  %v2699_v8 = vcombine.high %v587_v7, %v587_v7  ;;  %v588_v11 = vld [vmem:[%s3946_s1 + $0x178] sm:$0xff] }
  0x77   : > { %2167 = vmatprep.mubr.bf16.mxu1 %v3389_v15  ;;  %v2700_v15 = vcombine.low %v588_v11, %v588_v11 }
  0x78   : > { %3086 = vmatpush3.bf16.msra.mxu0 %v3382_v9  ;;  %v2698_v9 = vcombine.low %v587_v7, %v587_v7 }
  0x79   : > { %3120 = vmatpush3.bf16.msra.mxu1 %v3383_v10  ;;  %3087 = vmatprep.subr.bf16.mxu0 %v3387_v13  ;;  %v3444_v10 = vld [vmem:[%s3552_s27 + $0x460] sm:$0xff]  }
  0x7a   : > { %3121 = vmatprep.subr.bf16.mxu1 %v3388_v14  ;;  %v3446_v13 = vld [vmem:[%s3552_s27 + $0x420] sm:$0xff]  }
  0x7b   : > { %2112 = vmatmul.mubr.bf16.gmra.mrb[28].mxu0 %v3386_v12  ;;  %v2701_v12 = vcombine.high %v588_v11, %v588_v11  ;;  %v3447_v14 = vld [vmem:[%s3552_s27 + $0x4a0] sm:$0xff]  }
  0x7c   : > { %3088 = vmatpush3.bf16.msra.mxu0 %v3391_v16  ;;  %2168 = vmatmul.mubr.bf16.gmra.mrb[28].mxu1 %v3393_v18  ;;  %v3449_v16 = vld [vmem:[%s3552_s27 + $0x468] sm:$0xff]  }
  0x7d   : > { %3122 = vmatpush3.bf16.msra.mxu1 %v3392_v17  ;;  %3089 = vmatprep.subr.bf16.mxu0 %v3394_v19  ;;  %v3450_v17 = vld [vmem:[%s3552_s27 + $0x428] sm:$0xff]   ;;  %v3452_v19 = vld [vmem:[%s3552_s27 + $0x470] sm:$0xff]  }
  0x7e   : > { %3123 = vmatprep.subr.bf16.mxu1 %v3395_v20  ;;  %2119 = vmatprep.mubr.bf16.mxu0 %v2695_v24  ;;  %v3451_v18 = vld [vmem:[%s3552_s27 + $0x4a8] sm:$0xff]   ;;  %v3453_v20 = vld [vmem:[%s3552_s27 + $0x430] sm:$0xff]  }
  0x7f   : > { %2175 = vmatprep.mubr.bf16.mxu1 %v2697_v29  ;;  %v3460_v24 = vld [vmem:[%s3946_s1 + $0x44] ss:$80 sps:$4 sm:$0xff]   ;;  %v3462_v29 = vld [vmem:[%s3552_s27 + $0x4c8] sm:$0xff]  }
  0x80   : > { %3090 = vmatpush3.bf16.msra.mxu0 %v3396_v21  ;;  %v3454_v21 = vld [vmem:[%s3552_s27 + $0x4b0] sm:$0xff]  }
  0x81   : > { %3124 = vmatpush3.bf16.msra.mxu1 %v3397_v22  ;;  %3091 = vmatprep.subr.bf16.mxu0 %v3400_v26  ;;  %v3455_v22 = vld [vmem:[%s3552_s27 + $0x478] sm:$0xff]   ;;  %v3458_v26 = vld [vmem:[%s3946_s1 + $0x40] ss:$80 sps:$4 sm:$0xff]  }
  0x82   : > { %3125 = vmatprep.subr.bf16.mxu1 %v3401_v27  ;;  %v3463_v27 = vld [vmem:[%s3946_s1 + $0xe4] ss:$80 sps:$4 sm:$0xff]  }
  0x83   : > { %2120 = vmatmul.mubr.bf16.gmra.mrb[32].mxu0 %v2694_v25  ;;  %v3457_v25 = vld [vmem:[%s3552_s27 + $0x4b8] sm:$0xff]  }
  0x84   : > { %3092 = vmatpush3.bf16.msra.mxu0 %v3403_v30  ;;  %2176 = vmatmul.mubr.bf16.gmra.mrb[32].mxu1 %v2696_v31  ;;  %v589_v30 = vld [vmem:[%s3946_s1 + $0x180] sm:$0xff]  ;;  %v3474_v31 = vld [vmem:[%s3946_s1 + $0x4c] ss:$80 sps:$4 sm:$0xff]  }
  0x85   : > { %3126 = vmatpush3.bf16.msra.mxu1 %v3404_v32  ;;  %3093 = vmatprep.subr.bf16.mxu0 %v3406_v33  ;;  %v3465_v32 = vld [vmem:[%s3946_s1 + $0xe0] ss:$80 sps:$4 sm:$0xff]   ;;  %v2443_v33 = vld [vmem:[%s3949_s4 + $0x8] sm:$0xff]  ;;  %v2703_v35 = vcombine.high %v589_v30, %v589_v30 }
  0x86   : > { %3127 = vmatprep.subr.bf16.mxu1 %v3407_v34  ;;  %2215 = vmatprep.mubr.bf16.mxu0 %v3420_v48  ;;  %v2442_v34 = vld [vmem:[%s3949_s4] sm:$0xff] }
  0x87   : > { %2271 = vmatprep.mubr.bf16.mxu1 %v3423_v50  ;;  %2454 = vperm.xlu0 %3240, %v2443_v33  }
  0x88   : > { %3094 = vmatpush3.bf16.msra.mxu0 %v3408_v36  ;;  %2449 = vperm.xlu1 %3241, %v2442_v34   ;;  %v3466_v36 = vld [vmem:[%s3552_s27 + $0x4d0] sm:$0xff]  }
  0x89   : > { %3128 = vmatpush3.bf16.msra.mxu1 %v3409_v37  ;;  %3095 = vmatprep.subr.bf16.mxu0 %v3410_v38  ;;  %v2445_v37 = vld [vmem:[%s3949_s4 + $0x18] sm:$0xff]  ;;  %v2444_v38 = vld [vmem:[%s3949_s4 + $0x10] sm:$0xff] }
  0x8a   : > { %3129 = vmatprep.subr.bf16.mxu1 %v3411_v39  ;;  %v3467_v39 = vld [vmem:[%s3552_s27 + $0x4d8] sm:$0xff]  }
  0x8b   : > { %2464 = vperm.xlu0 %3240, %v2445_v37  }
  0x8c   : > { %3096 = vmatpush3.bf16.msra.mxu0 %v3412_v41  ;;  %2459 = vperm.xlu1 %3241, %v2444_v38   ;;  %v2702_v41 = vcombine.low %v589_v30, %v589_v30 }
  0x8d   : > { %3130 = vmatpush3.bf16.msra.mxu1 %v3413_v42  ;;  %3097 = vmatprep.subr.bf16.mxu0 %v3414_v43  ;;  %v3470_v42 = vld [vmem:[%s3552_s27 + $0x4e0] sm:$0xff]   ;;  %v3471_v43 = vld [vmem:[%s3552_s27 + $0x4e8] ss:$0 sps:$4 sm:$0xff]  }
  0x8e   : > { %3131 = vmatprep.subr.bf16.mxu1 %v3415_v44  ;;  %v1845_v44 = vsel %vm1843_vm1, %v3471_v43, 0 }
  0x90   : > { %3098 = vmatpush3.bf16.msra.mxu0 %v3416_v45  ;;  %2469 = vperm.xlu1 %3241, %v2446_v40   ;;  %v3472_v45 = vld [vmem:[%s3946_s1 + $0x48] ss:$80 sps:$4 sm:$0xff]  }
  0x91   : > { %3132 = vmatpush3.bf16.msra.mxu1 %v3417_v46  ;;  %3151 = vmatprep.subr.bf16.mxu0 %v3424_v51  ;;  %v3475_v46 = vld [vmem:[%s3946_s1 + $0xec] ss:$80 sps:$4 sm:$0xff]  }
  0x92   : > { %2351 = vmatprep.subr.bf16.mxu1 %v3498_v5 }
  0x93   : > { %2216 = vmatmul.mubr.bf16.vlgmr.msra.gmra.mrb[36].mxu0 %v3418_v47  ;;  %v590_v47 = vld [vmem:[%s3946_s1 + $0x188] sm:$0xff] }
  0x94   : > { %2272 = vmatmul.mubr.bf16.vlgmr.msra.gmra.mrb[36].mxu1 %v3421_v49  ;;  %3152 = vmatpush3.bf16.msra.mxu0 %v3425_v53  ;;  %v2705_v48 = vcombine.high %v590_v47, %v590_v47  ;;  %v2704_v49 = vcombine.low %v590_v47, %v590_v47 }
  0x95   : > { %2352 = vmatpush1.bf16.msra.mxu1 %v3426_v54  ;;  %3153 = vmatprep.subr.bf16.mxu0 %v3427_v55 }
  0x96   : > { %2353 = vmatprep.subr.bf16.mxu1 %v3498_v5  ;;  %2223 = vmatprep.mubr.bf16.mxu0 %v3430_v59 }
  0x97   : > { %2279 = vmatprep.mubr.bf16.mxu1 %v3434_v62 }
  0x98   : > { %3154 = vmatpush3.bf16.msra.mxu0 %v3428_v57 }
  0x99   : > { %2354 = vmatpush1.bf16.msra.mxu1 %v3429_v58  ;;  %3155 = vmatprep.subr.bf16.mxu0 %v3433_v61 }
  0x9a   : > { %2355 = vmatprep.subr.bf16.mxu1 %v3498_v5 }
  0x9b   : > { %2224 = vmatmul.mubr.bf16.gmra.mrb[40].mxu0 %v3432_v60 }
  0x9c   : > { %3156 = vmatpush3.bf16.msra.mxu0 %v3436_v63  ;;  %2280 = vmatmul.mubr.bf16.gmra.mrb[40].mxu1 %v3438_v1 }
  0x9d   : > { %2356 = vmatpush1.bf16.msra.mxu1 %v3437_v0  ;;  %3157 = vmatprep.subr.bf16.mxu0 %v3439_v2 }
  0x9e   : > { %2357 = vmatprep.subr.bf16.mxu1 %v3498_v5  ;;  %2231 = vmatprep.mubr.bf16.mxu0 %v2699_v8 }
  0x9f   : > { %2287 = vmatprep.mubr.bf16.mxu1 %v2701_v12 }
  0xa0   : > { %3158 = vmatpush3.bf16.msra.mxu0 %v3440_v4 }
  0xa1   : > { %2358 = vmatpush1.bf16.msra.mxu1 %v3441_v6  ;;  %3159 = vmatprep.subr.bf16.mxu0 %v3444_v10 }
  0xa2   : > { %2359 = vmatprep.subr.bf16.mxu1 %v3498_v5 }
  0xa3   : > { %2232 = vmatmul.mubr.bf16.gmra.mrb[44].mxu0 %v2698_v9 }
  0xa4   : > { %3160 = vmatpush3.bf16.msra.mxu0 %v3446_v13  ;;  %2288 = vmatmul.mubr.bf16.gmra.mrb[44].mxu1 %v2700_v15 }
  0xa5   : > { %2360 = vmatpush1.bf16.msra.mxu1 %v3447_v14  ;;  %3161 = vmatprep.subr.bf16.mxu0 %v3449_v16 }
  0xa6   : > { %2361 = vmatprep.subr.bf16.mxu1 %v3498_v5  ;;  %2327 = vmatprep.mubr.bf16.mxu0 %v3460_v24 }
  0xa7   : > { %2864 = vmatprep.mubr.msk.bf16.mxu1 %vm1833_vm0, %v3474_v31 }
  0xa8   : > { %3162 = vmatpush3.bf16.msra.mxu0 %v3450_v17 }
  0xa9   : > { %2362 = vmatpush1.bf16.msra.mxu1 %v3451_v18  ;;  %3163 = vmatprep.subr.bf16.mxu0 %v3452_v19 }
  0xaa   : > { %2363 = vmatprep.subr.bf16.mxu1 %v3498_v5 }
  0xac   : > { %3164 = vmatpush3.bf16.msra.mxu0 %v3453_v20 }
  0xad   : > { %2364 = vmatpush1.bf16.msra.mxu1 %v3454_v21  ;;  %3165 = vmatprep.subr.bf16.mxu0 %v3455_v22 }
  0xae   : > { %2365 = vmatprep.subr.bf16.mxu1 %v3498_v5 }
  0xb0   : > { %3166 = vmatpush3.bf16.msra.mxu0 %v3456_v23 }
  0xb1   : > { %2366 = vmatpush1.bf16.msra.mxu1 %v3457_v25 }
  0xb2   : > { %2367 = vmatprep.subr.bf16.mxu1 %v3498_v5 }
  0xb3   : > { %2328 = vmatmul.mubr.bf16.vlgmr.msra.gmra.mrb[48].mxu0 %v3458_v26 }
  0xb4   : > { %2335 = vmatprep.mubr.bf16.mxu0 %v3463_v27 }
  0xb5   : > { %2368 = vmatpush1.bf16.msra.mxu1 %v3461_v28 }
  0xb6   : > { %2369 = vmatprep.subr.bf16.mxu1 %v3498_v5 }
  0xb9   : > { %2370 = vmatpush1.bf16.msra.mxu1 %v3462_v29 }
  0xba   : > { %2371 = vmatprep.subr.bf16.mxu1 %v3498_v5 }
  0xbb   : > { %2336 = vmatmul.mubr.bf16.gmra.mrb[52].mxu0 %v3465_v32 }
  0xbc   : > { %2343 = vmatprep.mubr.bf16.mxu0 %v2703_v35 }
  0xbd   : > { %2372 = vmatpush1.bf16.msra.mxu1 %v3466_v36 }
  0xbe   : > { %2373 = vmatprep.subr.bf16.mxu1 %v3498_v5 }
  0xc1   : > { %2374 = vmatpush1.bf16.msra.mxu1 %v3467_v39 }
  0xc2   : > { %2375 = vmatprep.subr.bf16.mxu1 %v3498_v5 }
  0xc3   : > { %2344 = vmatmul.mubr.bf16.gmra.mrb[56].mxu0 %v2702_v41 }
  0xc5   : > { %2376 = vmatpush1.bf16.msra.mxu1 %v3470_v42 }
  0xc6   : > { %2377 = vmatprep.subr.bf16.mxu1 %v3498_v5  ;;  %v3477_v5 = vld [vmem:[%s3946_s1 + $0xe8] ss:$80 sps:$4 sm:$0xff]  }
  0xc9   : > { %2378 = vmatpush1.bf16.msra.mxu1 %v1845_v44 }
  0xcc   : > { %2384 = vmatmul.mubr.bf16.vlgmr.msra.gmra.mrb[48].mxu1 %v3472_v45 }
  0xcd   : > { %2865 = vmatprep.mubr.msk.bf16.mxu1 %vm1833_vm0, %v3475_v46 }
  0xd4   : > { %2392 = vmatmul.mubr.bf16.gmra.mrb[52].mxu1 %v3477_v5 }
  0xd5   : > { %2866 = vmatprep.mubr.msk.bf16.mxu1 %vm1833_vm0, %v2705_v48 }
  0xdc   : > { %2400 = vmatmul.mubr.bf16.gmra.mrb[56].mxu1 %v2704_v49 }
  0xde   : > { %v599_v4 = vpop.permute.xlu0 %598 }
  0xe2   : > { %v604_v14 = vpop.permute.xlu0 %603 }
  0xe9   : > { %v609_v27 = vpop.permute.xlu1 %608 }
  0xed   : > { %v614_v30 = vpop.permute.xlu1 %613 }
  0xf2   : > { %v619_v45 = vpop.permute.xlu0 %618 }
 0x106   : > { %v2895_v50 = vpop.f32.mrb[0].mxu0 }
 0x107   : > { %v2929_v51 = vpop.f32.mrb[0].mxu1  ;;  %v2896_v52 = vpop.f32.mrb[1].mxu0 }
 0x108   : > { %v2897_v53 = vadd.f32 %v2896_v52, %v2895_v50  ;;  %v2930_v54 = vpop.f32.mrb[1].mxu1  ;;  %v2898_v55 = vpop.f32.mrb[2].mxu0 }
 0x109   : > { %v2931_v56 = vadd.f32 %v2930_v54, %v2929_v51  ;;  %v2932_v57 = vpop.f32.mrb[2].mxu1  ;;  %v2899_v58 = vpop.f32.mrb[3].mxu0 }
 0x10a   : > { %v2900_v59 = vadd.f32 %v2899_v58, %v2898_v55  ;;  %v2933_v60 = vpop.f32.mrb[3].mxu1  ;;  %v1882_v8 = vadd.f32 %v2897_v53, %v599_v4 }
 0x10b   : > { %v2934_v61 = vadd.f32 %v2933_v60, %v2932_v57 }
 0x10c   : > { %v1938_v12 = vadd.f32 %v2931_v56, %v1882_v8  ;;  %v1885_v15 = vadd.f32 %v2900_v59, %v604_v14 }
 0x10e   : > { %v2901_v62 = vpop.f32.mrb[4].mxu0  ;;  %v1941_v19 = vadd.f32 %v2934_v61, %v1885_v15 }
 0x10f   : > { %v2902_v63 = vpop.f32.mrb[5].mxu0  ;;  %v2935_v0 = vpop.f32.mrb[4].mxu1 }
 0x110   : > { %v2903_v1 = vadd.f32 %v2902_v63, %v2901_v62  ;;  %v2904_v2 = vpop.f32.mrb[6].mxu0  ;;  %v2936_v3 = vpop.f32.mrb[5].mxu1 }
 0x111   : > { %v2905_v6 = vpop.f32.mrb[7].mxu0  ;;  %v2937_v7 = vadd.f32 %v2936_v3, %v2935_v0  ;;  %v2938_v10 = vpop.f32.mrb[6].mxu1 }
 0x112   : > { %v2906_v9 = vadd.f32 %v2905_v6, %v2904_v2  ;;  %v2939_v11 = vpop.f32.mrb[7].mxu1  ;;  %v1890_v28 = vadd.f32 %v2903_v1, %v609_v27 }
 0x113   : > { %v2940_v13 = vadd.f32 %v2939_v11, %v2938_v10 }
 0x114   : > { %v1946_v29 = vadd.f32 %v2937_v7, %v1890_v28  ;;  %v1893_v31 = vadd.f32 %v2906_v9, %v614_v30 }
 0x116   : > { %v2907_v16 = vpop.f32.mrb[8].mxu0  ;;  %v1949_v33 = vadd.f32 %v2940_v13, %v1893_v31 }
 0x117   : > { %v2941_v17 = vpop.f32.mrb[8].mxu1  ;;  %v2908_v18 = vpop.f32.mrb[9].mxu0 }
 0x118   : > { %v2909_v20 = vadd.f32 %v2908_v18, %v2907_v16  ;;  %v2942_v21 = vpop.f32.mrb[9].mxu1  ;;  %v2910_v22 = vpop.f32.mrb[10].mxu0  ;;  %v3499_v16 = vmov 0.0|0.0  }
 0x119   : > { %v2943_v23 = vadd.f32 %v2942_v21, %v2941_v17  ;;  %v2944_v24 = vpop.f32.mrb[10].mxu1  ;;  %v2911_v25 = vpop.f32.mrb[11].mxu0  ;;  %3220 = vmatprep.subr.bf16.mxu0 %v3499_v16 }
 0x11a   : > { %v2945_v26 = vpop.f32.mrb[11].mxu1  ;;  %v1898_v47 = vadd.f32 %v2909_v20, %v619_v45 }
 0x11c   : > { %v1954_v49 = vadd.f32 %v2943_v23, %v1898_v47 }
 0x126   : > { %v2963_v32 = vpop.f32.mrb[12].mxu0 }
 0x127   : > { %v2997_v34 = vpop.f32.mrb[12].mxu1  ;;  %v2964_v35 = vpop.f32.mrb[13].mxu0 }
 0x128   : > { %v2965_v36 = vadd.f32 %v2964_v35, %v2963_v32  ;;  %v2998_v37 = vpop.f32.mrb[13].mxu1  ;;  %v2966_v38 = vpop.f32.mrb[14].mxu0  ;;  %v3501_v32 = vmov 0.0  }
 0x129   : > { %v2999_v39 = vadd.f32 %v2998_v37, %v2997_v34  ;;  %v3000_v40 = vpop.f32.mrb[14].mxu1  ;;  %v2967_v41 = vpop.f32.mrb[15].mxu0  ;;  %3205 = vmatprep.mubr.msk.f32.mxu0 %vm3500_vm2, %v3501_v32 }
 0x12a   : > { %v1994_v42 = vadd.f32 %v2965_v36, %v1938_v12  ;;  %v2968_v43 = vadd.f32 %v2967_v41, %v2966_v38  ;;  %v3001_v44 = vpop.f32.mrb[15].mxu1 }
 0x12b   : > { %v3002_v46 = vadd.f32 %v3001_v44, %v3000_v40 }
 0x12c   : > { %v2050_v5 = vadd.f32 %v2999_v39, %v1994_v42  ;;  %v1997_v48 = vadd.f32 %v2968_v43, %v1941_v19 }
 0x12e   : > { %v2053_v50 = vadd.f32 %v3002_v46, %v1997_v48  ;;  %v2969_v51 = vpop.f32.mrb[16].mxu0 }
 0x12f   : > { %v2970_v52 = vpop.f32.mrb[17].mxu0  ;;  %v3003_v58 = vpop.f32.mrb[16].mxu1 }
 0x130   : > { %v2971_v53 = vadd.f32 %v2970_v52, %v2969_v51  ;;  %v2972_v54 = vpop.f32.mrb[18].mxu0  ;;  %v3004_v60 = vpop.f32.mrb[17].mxu1 }
 0x131   : > { %v2973_v55 = vpop.f32.mrb[19].mxu0  ;;  %v3005_v61 = vadd.f32 %v3004_v60, %v3003_v58  ;;  %v3006_v62 = vpop.f32.mrb[18].mxu1 }
 0x132   : > { %v2002_v56 = vadd.f32 %v2971_v53, %v1946_v29  ;;  %v2974_v57 = vadd.f32 %v2973_v55, %v2972_v54  ;;  %v3007_v63 = vpop.f32.mrb[19].mxu1 }
 0x133   : > { %v3008_v1 = vadd.f32 %v3007_v63, %v3006_v62 }
 0x134   : > { %v2005_v59 = vadd.f32 %v2974_v57, %v1949_v33  ;;  %v2058_v0 = vadd.f32 %v3005_v61, %v2002_v56 }
 0x136   : > { %v2061_v2 = vadd.f32 %v3008_v1, %v2005_v59  ;;  %v2975_v3 = vpop.f32.mrb[20].mxu0 }
 0x137   : > { %v2976_v4 = vpop.f32.mrb[21].mxu0  ;;  %v3009_v8 = vpop.f32.mrb[20].mxu1 }
 0x138   : > { %v2977_v6 = vadd.f32 %v2976_v4, %v2975_v3  ;;  %v2978_v7 = vpop.f32.mrb[22].mxu0  ;;  %v3010_v11 = vpop.f32.mrb[21].mxu1 }
 0x139   : > { %v2979_v9 = vpop.f32.mrb[23].mxu0  ;;  %v3011_v12 = vadd.f32 %v3010_v11, %v3009_v8  ;;  %v3012_v13 = vpop.f32.mrb[22].mxu1 }
 0x13a   : > { %v2010_v10 = vadd.f32 %v2977_v6, %v1954_v49  ;;  %v3013_v14 = vpop.f32.mrb[23].mxu1 }
 0x13c   : > { %v2066_v15 = vadd.f32 %v3011_v12, %v2010_v10 }
 0x146   : > { %v3031_v17 = vpop.f32.mrb[24].mxu0 }
 0x147   : > { %v3065_v18 = vpop.f32.mrb[24].mxu1  ;;  %v3032_v19 = vpop.f32.mrb[25].mxu0 }
 0x148   : > { %v3033_v20 = vadd.f32 %v3032_v19, %v3031_v17  ;;  %v3066_v21 = vpop.f32.mrb[25].mxu1  ;;  %v3034_v22 = vpop.f32.mrb[26].mxu0 }
 0x149   : > { %v3067_v23 = vadd.f32 %v3066_v21, %v3065_v18  ;;  %v3068_v24 = vpop.f32.mrb[26].mxu1  ;;  %v3035_v25 = vpop.f32.mrb[27].mxu0 }
 0x14a   : > { %v2106_v26 = vadd.f32 %v3033_v20, %v2050_v5  ;;  %v3036_v27 = vadd.f32 %v3035_v25, %v3034_v22  ;;  %v3069_v28 = vpop.f32.mrb[27].mxu1 }
 0x14b   : > { %v3070_v29 = vadd.f32 %v3069_v28, %v3068_v24 }
 0x14c   : > { %v2162_v30 = vadd.f32 %v3067_v23, %v2106_v26  ;;  %v2109_v31 = vadd.f32 %v3036_v27, %v2053_v50 }
 0x14e   : > { %v2165_v33 = vadd.f32 %v3070_v29, %v2109_v31  ;;  %v3037_v34 = vpop.f32.mrb[28].mxu0 }
 0x14f   : > { %v3038_v35 = vpop.f32.mrb[29].mxu0  ;;  %v3071_v41 = vpop.f32.mrb[28].mxu1 }
 0x150   : > { %v3039_v36 = vadd.f32 %v3038_v35, %v3037_v34  ;;  %v3040_v37 = vpop.f32.mrb[30].mxu0  ;;  %v3072_v43 = vpop.f32.mrb[29].mxu1 }
 0x151   : > { %v3041_v38 = vpop.f32.mrb[31].mxu0  ;;  %v3073_v44 = vadd.f32 %v3072_v43, %v3071_v41  ;;  %v3074_v45 = vpop.f32.mrb[30].mxu1 }
 0x152   : > { %v2114_v39 = vadd.f32 %v3039_v36, %v2058_v0  ;;  %v3042_v40 = vadd.f32 %v3041_v38, %v3040_v37  ;;  %v3075_v46 = vpop.f32.mrb[31].mxu1 }
 0x153   : > { %v3076_v5 = vadd.f32 %v3075_v46, %v3074_v45 }
 0x154   : > { %v2117_v42 = vadd.f32 %v3042_v40, %v2061_v2  ;;  %v2170_v47 = vadd.f32 %v3073_v44, %v2114_v39 }
 0x156   : > { %v2173_v48 = vadd.f32 %v3076_v5, %v2117_v42  ;;  %v3043_v49 = vpop.f32.mrb[32].mxu0 }
 0x157   : > { %v3044_v50 = vpop.f32.mrb[33].mxu0  ;;  %v3077_v53 = vpop.f32.mrb[32].mxu1 }
 0x158   : > { %v3045_v51 = vadd.f32 %v3044_v50, %v3043_v49  ;;  %v3046_v52 = vpop.f32.mrb[34].mxu0  ;;  %v3078_v56 = vpop.f32.mrb[33].mxu1 }
 0x159   : > { %v3047_v54 = vpop.f32.mrb[35].mxu0  ;;  %v3079_v57 = vadd.f32 %v3078_v56, %v3077_v53  ;;  %v3080_v58 = vpop.f32.mrb[34].mxu1 }
 0x15a   : > { %v2122_v55 = vadd.f32 %v3045_v51, %v2066_v15  ;;  %v3081_v59 = vpop.f32.mrb[35].mxu1 }
 0x15c   : > { %v2178_v60 = vadd.f32 %v3079_v57, %v2122_v55 }
 0x166   : > { %v3099_v61 = vpop.f32.mrb[36].mxu0 }
 0x167   : > { %v3100_v62 = vpop.f32.mrb[37].mxu0  ;;  %v3133_v63 = vpop.f32.mrb[36].mxu1 }
 0x168   : > { %v3101_v0 = vadd.f32 %v3100_v62, %v3099_v61  ;;  %v3102_v1 = vpop.f32.mrb[38].mxu0  ;;  %v3134_v2 = vpop.f32.mrb[37].mxu1 }
 0x169   : > { %v3103_v3 = vpop.f32.mrb[39].mxu0  ;;  %v3135_v6 = vadd.f32 %v3134_v2, %v3133_v63  ;;  %v3136_v7 = vpop.f32.mrb[38].mxu1 }
 0x16a   : > { %v2218_v4 = vadd.f32 %v3101_v0, %v2162_v30  ;;  %v3104_v8 = vadd.f32 %v3103_v3, %v3102_v1  ;;  %v3137_v9 = vpop.f32.mrb[39].mxu1 }
 0x16b   : > { %v3138_v12 = vadd.f32 %v3137_v9, %v3136_v7 }
 0x16c   : > { %v2274_v10 = vadd.f32 %v3135_v6, %v2218_v4  ;;  %v2221_v11 = vadd.f32 %v3104_v8, %v2165_v33 }
 0x16e   : > { %v2277_v13 = vadd.f32 %v3138_v12, %v2221_v11  ;;  %v3105_v14 = vpop.f32.mrb[40].mxu0 }
 0x16f   : > { %v3106_v15 = vpop.f32.mrb[41].mxu0  ;;  %v3139_v22 = vpop.f32.mrb[40].mxu1 }
 0x170   : > { %v3107_v17 = vadd.f32 %v3106_v15, %v3105_v14  ;;  %v3108_v18 = vpop.f32.mrb[42].mxu0  ;;  %v3140_v24 = vpop.f32.mrb[41].mxu1 }
 0x171   : > { %v3109_v19 = vpop.f32.mrb[43].mxu0  ;;  %v3141_v25 = vadd.f32 %v3140_v24, %v3139_v22  ;;  %v3142_v26 = vpop.f32.mrb[42].mxu1 }
 0x172   : > { %v2226_v20 = vadd.f32 %v3107_v17, %v2170_v47  ;;  %v3110_v21 = vadd.f32 %v3109_v19, %v3108_v18  ;;  %v3143_v27 = vpop.f32.mrb[43].mxu1 }
 0x173   : > { %v3144_v29 = vadd.f32 %v3143_v27, %v3142_v26 }
 0x174   : > { %v2229_v23 = vadd.f32 %v3110_v21, %v2173_v48  ;;  %v2282_v28 = vadd.f32 %v3141_v25, %v2226_v20 }
 0x176   : > { %v3111_v30 = vpop.f32.mrb[44].mxu0  ;;  %v2285_v31 = vadd.f32 %v3144_v29, %v2229_v23 }
 0x177   : > { %v3112_v33 = vpop.f32.mrb[45].mxu0  ;;  %v3145_v36 = vpop.f32.mrb[44].mxu1 }
 0x178   : > { %v3113_v34 = vadd.f32 %v3112_v33, %v3111_v30  ;;  %v3114_v35 = vpop.f32.mrb[46].mxu0  ;;  %v3146_v39 = vpop.f32.mrb[45].mxu1 }
 0x179   : > { %v3115_v37 = vpop.f32.mrb[47].mxu0  ;;  %v3147_v40 = vadd.f32 %v3146_v39, %v3145_v36  ;;  %v3148_v41 = vpop.f32.mrb[46].mxu1 }
 0x17a   : > { %v2234_v38 = vadd.f32 %v3113_v34, %v2178_v60  ;;  %v3149_v42 = vpop.f32.mrb[47].mxu1 }
 0x17c   : > { %v2290_v43 = vadd.f32 %v3147_v40, %v2234_v38 }
 0x186   : > { %v3167_v44 = vpop.f32.mrb[48].mxu0 }
 0x187   : > { %v3168_v45 = vpop.f32.mrb[49].mxu0 }
 0x188   : > { %v3169_v46 = vadd.f32 %v3168_v45, %v3167_v44  ;;  %v3170_v47 = vpop.f32.mrb[50].mxu0 }
 0x189   : > { %v3171_v5 = vpop.f32.mrb[51].mxu0 }
 0x18a   : > { %v3172_v48 = vadd.f32 %v3171_v5, %v3170_v47  ;;  %v2330_v49 = vadd.f32 %v3169_v46, %v2274_v10  ;;  %v2437_v47 = vld [vmem:[%s3948_s3] sm:$0xff]  ;;  %v2438_v5 = vld [vmem:[%s3948_s3 + $0x8] sm:$0xff] }
 0x18c   : > { %v2333_v50 = vadd.f32 %v3172_v48, %v2277_v13  ;;  %v2439_v48 = vld [vmem:[%s3948_s3 + $0x10] sm:$0xff] }
 0x18e   : > { %v3173_v51 = vpop.f32.mrb[52].mxu0 }
 0x18f   : > { %v3174_v52 = vpop.f32.mrb[53].mxu0 }
 0x190   : > { %v3175_v53 = vadd.f32 %v3174_v52, %v3173_v51  ;;  %v3176_v54 = vpop.f32.mrb[54].mxu0  ;;  %v2450_v51 = vpop.permute.xlu1 %2449 }
 0x191   : > { %v3177_v55 = vpop.f32.mrb[55].mxu0 }
 0x192   : > { %v3178_v56 = vadd.f32 %v3177_v55, %v3176_v54  ;;  %v2338_v57 = vadd.f32 %v3175_v53, %v2282_v28  ;;  %v2455_v55 = vpop.permute.xlu0 %2454 }
 0x194   : > { %v2341_v58 = vadd.f32 %v3178_v56, %v2285_v31 }
 0x196   : > { %v3179_v59 = vpop.f32.mrb[56].mxu0 }
 0x197   : > { %v3180_v60 = vpop.f32.mrb[57].mxu0 }
 0x198   : > { %v3181_v61 = vadd.f32 %v3180_v60, %v3179_v59  ;;  %v3182_v62 = vpop.f32.mrb[58].mxu0 }
 0x199   : > { %v3183_v63 = vpop.f32.mrb[59].mxu0  ;;  %v2465_v62 = vpop.permute.xlu0 %2464 }
 0x19a   : > { %v2346_v0 = vadd.f32 %v3181_v61, %v2290_v43 }
 0x19f   : > { %v2385_v1 = vpop.f32.mrb[48].mxu1 }
 0x1a0   : > { %v2386_v2 = vadd.f32 %v2385_v1, %v2330_v49  ;;  %v2387_v3 = vpop.f32.mrb[49].mxu1  ;;  %v2440_v49 = vld [vmem:[%s3948_s3 + $0x18] sm:$0xff] }
 0x1a1   : > { %v2388_v4 = vpop.f32.mrb[50].mxu1 }
 0x1a2   : > { %v2412_v6 = vmin.f32 %v2386_v2, 0.0  ;;  %v2389_v7 = vadd.f32 %v2388_v4, %v2333_v50  ;;  %v2390_v8 = vpop.f32.mrb[51].mxu1  ;;  %vm2407_vm3 = vcmp.gt.f32.partialorder %v2386_v2, 0.0  ;;  %v2441_v50 = vld [vmem:[%s3948_s3 + $0x20] sm:$0xff] }
 0x1a4   : > { %v2417_v9 = vmul.f32 1.442695, %v2412_v6  ;;  %v2413_v10 = vmin.f32 %v2389_v7, 0.0  ;;  %vm2408_vm4 = vcmp.gt.f32.partialorder %v2389_v7, 0.0 }
 0x1a6   : > { %3480 = vpow2.f32 %v2417_v9  ;;  %v2419_v11 = vmul.f32 1.442695, %v2413_v10 }
 0x1a7   : > { %v2393_v12 = vpop.f32.mrb[52].mxu1 }
 0x1a8   : > { %3482 = vpow2.f32 %v2419_v11  ;;  %v2394_v13 = vadd.f32 %v2393_v12, %v2338_v57  ;;  %v2395_v14 = vpop.f32.mrb[53].mxu1 }
 0x1a9   : > { %v2396_v15 = vpop.f32.mrb[54].mxu1 }
 0x1aa   : > { %v2414_v17 = vmin.f32 %v2394_v13, 0.0  ;;  %v2397_v18 = vadd.f32 %v2396_v15, %v2341_v58  ;;  %v2398_v19 = vpop.f32.mrb[55].mxu1  ;;  %vm2409_vm5 = vcmp.gt.f32.partialorder %v2394_v13, 0.0  ;;  %v2460_v58 = vpop.permute.xlu1 %2459 }
 0x1ac   : > { %v2421_v20 = vmul.f32 1.442695, %v2414_v17  ;;  %v2415_v21 = vmin.f32 %v2397_v18, 0.0  ;;  %vm2410_vm6 = vcmp.gt.f32.partialorder %v2397_v18, 0.0 }
 0x1ae   : > { %3484 = vpow2.f32 %v2421_v20  ;;  %v2423_v22 = vmul.f32 1.442695, %v2415_v21 }
 0x1af   : > { %v2401_v23 = vpop.f32.mrb[56].mxu1 }
 0x1b0   : > { %v3481_v24 = vpop.eup %3480  ;;  %3486 = vpow2.f32 %v2423_v22  ;;  %v2402_v25 = vadd.f32 %v2401_v23, %v2346_v0  ;;  %v2403_v26 = vpop.f32.mrb[57].mxu1 }
 0x1b1   : > { %v2867_v27 = vadd.f32 -1.0, %v3481_v24  ;;  %v2404_v28 = vpop.f32.mrb[58].mxu1 }
 0x1b2   : > { %v3483_v29 = vpop.eup %3482  ;;  %v2416_v30 = vmin.f32 %v2402_v25, 0.0  ;;  %v2405_v31 = vpop.f32.mrb[59].mxu1  ;;  %vm2411_vm7 = vcmp.gt.f32.partialorder %v2402_v25, 0.0 }
 0x1b3   : > { %v2868_v33 = vadd.f32 -1.0, %v3483_v29  ;;  %v2432_v35 = vsel %vm2407_vm3, %v2386_v2, %v2867_v27  ;;  %v2470_v2 = vpop.permute.xlu1 %2469 }
 0x1b4   : > { %v2425_v34 = vmul.f32 1.442695, %v2416_v30 }
 0x1b5   : > { %v2433_v36 = vsel %vm2408_vm4, %v2389_v7, %v2868_v33 }
 0x1b6   : > { %v3221_v37 = vpack.c.bf16 %v2433_v36, %v2432_v35  ;;  %3488 = vpow2.f32 %v2425_v34 }
 0x1b8   : > { %v3485_v38 = vpop.eup %3484  ;;  %3222 = vmatpush3.bf16.msra.mxu0 %v3221_v37 }
 0x1b9   : > { %v2869_v39 = vadd.f32 -1.0, %v3485_v38  ;;  %3223 = vmatprep.subr.bf16.mxu0 %v3499_v16 }
 0x1ba   : > { %v3487_v40 = vpop.eup %3486 }
 0x1bb   : > { %v2870_v41 = vadd.f32 -1.0, %v3487_v40  ;;  %v2434_v42 = vsel %vm2409_vm5, %v2394_v13, %v2869_v39 }
 0x1bd   : > { %v2435_v43 = vsel %vm2410_vm6, %v2397_v18, %v2870_v41 }
 0x1be   : > { %v3224_v44 = vpack.c.bf16 %v2435_v43, %v2434_v42 }
 0x1c0   : > { %v3489_v45 = vpop.eup %3488  ;;  %3225 = vmatpush3.bf16.msra.mxu0 %v3224_v44 }
 0x1c1   : > { %3203 = vmatprep.subr.mxu0 %v3501_v32  ;;  %v2871_v46 = vadd.f32 -1.0, %v3489_v45 }
 0x1c3   : > { %v2436_v16 = vsel %vm2411_vm7, %v2402_v25, %v2871_v46 }
 0x1c4   : > { %3204 = vmatpush3.msra.mxu0 %v2436_v16 }
 0x1c5   : > { %3206 = vmatmul.mubr.msk.f32.vlgmr.msra.gmra.mrb[60].mxu0 %vm2472_vm8, %v2437_v47 }
 0x1c6   : > { %3208 = vmatprep.mubr.msk.f32.mxu0 %vm3500_vm2, %v3501_v32 }
 0x1c9   : > { %3209 = vmatmul.mubr.msk.f32.gmra.mrb[62].mxu0 %vm2472_vm8, %v2438_v5 }
 0x1ca   : > { %3211 = vmatprep.mubr.msk.f32.mxu0 %vm3500_vm2, %v3501_v32 }
 0x1cd   : > { %3212 = vmatmul.mubr.msk.f32.gmra.mrb[64].mxu0 %vm2472_vm8, %v2439_v48 }
 0x1ce   : > { %3214 = vmatprep.mubr.msk.f32.mxu0 %vm3500_vm2, %v3501_v32 }
 0x1d1   : > { %3215 = vmatmul.mubr.msk.f32.gmra.mrb[66].mxu0 %vm2472_vm8, %v2440_v49 }
 0x1d2   : > { %3217 = vmatprep.mubr.msk.f32.mxu0 %vm3500_vm2, %v3501_v32 }
 0x1d5   : > { %3218 = vmatmul.mubr.msk.f32.gmra.mrb[68].mxu0 %vm2472_vm8, %v2441_v50 }
 0x298   : > { %v2554_v52 = vpop.f32.mrb[60].mxu0 }
 0x299   : > { %v2555_v53 = vadd.f32 %v2554_v52, %v2450_v51  ;;  %v3207_v54 = vpop.f32.mrb[61].mxu0 }
 0x29b   : > { %2579 = vst.msk [vmem:[%s224_s23] sm:$0xff] %vm2578_vm9, %v2555_v53 }
 0x29c   : > { %v2559_v56 = vpop.f32.mrb[62].mxu0 }
 0x29d   : > { %v2560_v32 = vadd.f32 %v2559_v56, %v2455_v55  ;;  %v3210_v57 = vpop.f32.mrb[63].mxu0 }
 0x29f   : > { %2580 = vst.msk [vmem:[%s224_s23 + $0x8] sm:$0xff] %vm2578_vm9, %v2560_v32 }
 0x2a0   : > { %v2564_v59 = vpop.f32.mrb[64].mxu0 }
 0x2a1   : > { %v2565_v60 = vadd.f32 %v2564_v59, %v2460_v58  ;;  %v3213_v61 = vpop.f32.mrb[65].mxu0 }
 0x2a3   : > { %2581 = vst.msk [vmem:[%s224_s23 + $0x10] sm:$0xff] %vm2578_vm9, %v2565_v60 }
 0x2a4   : > { %v2569_v63 = vpop.f32.mrb[66].mxu0 }
 0x2a5   : > { %v2570_v0 = vadd.f32 %v2569_v63, %v2465_v62  ;;  %v3216_v1 = vpop.f32.mrb[67].mxu0 }
 0x2a7   : > { %2582 = vst.msk [vmem:[%s224_s23 + $0x18] sm:$0xff] %vm2578_vm9, %v2570_v0 }
 0x2a8   : > { %v2574_v3 = vpop.f32.mrb[68].mxu0 }
 0x2a9   : > { %v2575_v4 = vadd.f32 %v2574_v3, %v2470_v2  ;;  %v3219_v6 = vpop.f32.mrb[69].mxu0 }
 0x2ab   : > { %2583 = vst.msk [vmem:[%s224_s23 + $0x20] sm:$0xff] %vm2578_vm9, %v2575_v4 }
 0x2ac PF: > { %s15_s18 = sadd.s32 1, %s3496_s18  }
 0x2ad   : > { %p12_p4 = scmp.ge.s32.totalorder %s15_s18, 4  }
 0x2af   :  { %14 = sbr.rel (!%p12_p4) target bundleno = 1 (0x1), region = 70 }

</bundles_post_ra>
